<compile_context>
chip_gen: v6e
topology: v6e:2x2x1
jax: 0.10.0
libtpu: 0.0.40
codegen_flags: <defaults>
</compile_context>

<pallas_src>
import functools

import jax
import jax.numpy as jnp
from jax.experimental import pallas as pl
from jax.experimental.pallas import tpu as pltpu


# ----------------------------- Pallas kernel ------------------------------- #

def _layernorm(v, w, b, eps=1e-5):
    mu = jnp.mean(v, axis=-1, keepdims=True)
    var = jnp.mean((v - mu) ** 2, axis=-1, keepdims=True)
    return (v - mu) * jax.lax.rsqrt(var + eps) * w + b


def encoder_layer_kernel(
    x_full_ref,            # (1, S, D)  f32   full sequence (K/V source)
    x_q_ref,               # (1, TS, D) f32   query-tile rows (queries + residual)
    ln1_w_ref, ln1_b_ref,  # (1, D) f32
    wq_ref, bq_ref,        # (H, D, Dh) bf16, (H, 1, Dh) f32   (scale folded in)
    wk_ref, bk_ref,        # (H, D, Dh) bf16, (H, 1, Dh) f32
    wv_ref, bv_ref,        # (H, D, Dh) bf16, (H, 1, Dh) f32
    wo_ref, bo_ref,        # (H, Dh, D) bf16, (1, D) f32
    ln2_w_ref, ln2_b_ref,  # (1, D) f32
    w1_ref, b1_ref,        # (D, M) bf16, (1, M) f32
    w2_ref, b2_ref,        # (M, D) bf16, (1, D) f32
    o_ref,                 # (1, TS, D) f32
    *, heads,
):
    f32 = jnp.float32
    bf16 = jnp.bfloat16

    x_full = x_full_ref[0]                       # (S, D)
    x_q = x_q_ref[0]                             # (TS, D)
    tile_rows, dim = x_q.shape

    ln1_w = ln1_w_ref[0]
    ln1_b = ln1_b_ref[0]

    # LayerNorm in f32; cast only matmul operands to bf16.
    xn_full = _layernorm(x_full, ln1_w, ln1_b).astype(bf16)   # K/V source
    xn_q = _layernorm(x_q, ln1_w, ln1_b).astype(bf16)         # Q source

    def head_body(h, acc):
        # Per-head projections; attention scale already folded into wq / bq.
        qh = jnp.dot(xn_q, wq_ref[h], preferred_element_type=f32) + bq_ref[h]
        kh = jnp.dot(xn_full, wk_ref[h], preferred_element_type=f32) + bk_ref[h]
        vh = jnp.dot(xn_full, wv_ref[h], preferred_element_type=f32) + bv_ref[h]

        s = jnp.dot(qh.astype(bf16), kh.astype(bf16).T,
                    preferred_element_type=f32)               # (TS, S)
        m = jnp.max(s, axis=-1, keepdims=True)
        p = jnp.exp(s - m)                                    # f32 softmax
        inv = pl.reciprocal(jnp.sum(p, axis=-1, keepdims=True), approx=True)
        p = p * inv

        oh = jnp.dot(p.astype(bf16), vh.astype(bf16),
                     preferred_element_type=f32)              # (TS, Dh)
        # Accumulate the output projection per head (no concat / relayout).
        return acc + jnp.dot(oh.astype(bf16), wo_ref[h],
                             preferred_element_type=f32)      # (TS, D)

    attn = jax.lax.fori_loop(0, heads, head_body,
                             jnp.zeros((tile_rows, dim), f32))
    attn = attn + bo_ref[0]

    x1 = x_q + attn                                           # residual 1 (f32)

    # ---- MLP branch ------------------------------------------------------- #
    xn2 = _layernorm(x1, ln2_w_ref[0], ln2_b_ref[0])
    hdn = jnp.dot(xn2.astype(bf16), w1_ref[...],
                  preferred_element_type=f32) + b1_ref[0]     # (TS, M)
    # exact GELU (PyTorch nn.GELU default uses erf)
    hdn = 0.5 * hdn * (1.0 + jax.lax.erf(hdn * (2.0 ** -0.5)))
    mlp = jnp.dot(hdn.astype(bf16), w2_ref[...],
                  preferred_element_type=f32) + b2_ref[0]     # (TS, D)

    o_ref[0] = x1 + mlp                                       # residual 2


# ------------------------------- wrapper ------------------------------------ #

def _build_call(B, S, D, M, heads, TS, weight_pipeline_mode, vmem_limit, cost):
    Dh = D // heads
    num_tiles = pl.cdiv(S, TS)

    def pspec(shape):                           # small params, default buffering
        return pl.BlockSpec(shape, lambda b, t, _n=len(shape): (0,) * _n)

    def wspec(shape):                           # big weights, optionally 1-buffered
        idx = lambda b, t, _n=len(shape): (0,) * _n
        if weight_pipeline_mode is None:
            return pl.BlockSpec(shape, idx)
        return pl.BlockSpec(shape, idx, pipeline_mode=weight_pipeline_mode)

    kernel = functools.partial(encoder_layer_kernel, heads=heads)

    return pl.pallas_call(
        kernel,
        out_shape=jax.ShapeDtypeStruct((B, S, D), jnp.float32),
        grid=(B, num_tiles),
        in_specs=[
            pl.BlockSpec((1, S, D), lambda b, t: (b, 0, 0)),    # x (full, K/V)
            pl.BlockSpec((1, TS, D), lambda b, t: (b, t, 0)),   # x (query tile)
            pspec((1, D)), pspec((1, D)),                       # ln1 w, b
            wspec((heads, D, Dh)), pspec((heads, 1, Dh)),       # Wq (scaled), bq
            wspec((heads, D, Dh)), pspec((heads, 1, Dh)),       # Wk, bk
            wspec((heads, D, Dh)), pspec((heads, 1, Dh)),       # Wv, bv
            wspec((heads, Dh, D)), pspec((1, D)),               # Wo, bo
            pspec((1, D)), pspec((1, D)),                       # ln2 w, b
            wspec((D, M)), pspec((1, M)),                       # fc1 W^T, b
            wspec((M, D)), pspec((1, D)),                       # fc2 W^T, b
        ],
        out_specs=pl.BlockSpec((1, TS, D), lambda b, t: (b, t, 0)),
        compiler_params=pltpu.CompilerParams(
            dimension_semantics=("parallel", "parallel"),
            vmem_limit_bytes=vmem_limit),
        cost_estimate=cost,
    )


def transformer_encoder_layer(x, params, *, heads, q_tile=128):
    B, S, D = x.shape
    M = params["fc1_w"].shape[0]
    Dh = D // heads
    scale = 1.0 / (Dh ** 0.5)
    bf16, f32 = jnp.bfloat16, jnp.float32

    in_w = params["in_proj_w"].astype(f32)      # (3D, D)
    in_b = params["in_proj_b"].astype(f32)      # (3D,)

    def heads_in(w_t):                          # (D, D) -> (H, D, Dh)
        return w_t.reshape(D, heads, Dh).transpose(1, 0, 2)

    # bf16 weights (scale folded into Q); biases / LN params stay f32.
    wq_h = heads_in(in_w[:D].T * scale).astype(bf16)
    wk_h = heads_in(in_w[D:2 * D].T).astype(bf16)
    wv_h = heads_in(in_w[2 * D:].T).astype(bf16)
    bq_h = (in_b[:D] * scale).reshape(heads, 1, Dh)
    bk_h = in_b[D:2 * D].reshape(heads, 1, Dh)
    bv_h = in_b[2 * D:].reshape(heads, 1, Dh)
    wo_h = params["out_proj_w"].T.reshape(heads, Dh, D).astype(bf16)
    w1_t = params["fc1_w"].T.astype(bf16)       # (D, M)
    w2_t = params["fc2_w"].T.astype(bf16)       # (M, D)

    row = lambda a: a.reshape(1, -1).astype(f32)

    args = (
        x, x,
        row(params["ln1_w"]), row(params["ln1_b"]),
        wq_h, bq_h, wk_h, bk_h, wv_h, bv_h,
        wo_h, row(params["out_proj_b"]),
        row(params["ln2_w"]), row(params["ln2_b"]),
        w1_t, row(params["fc1_b"]),
        w2_t, row(params["fc2_b"]),
    )

    # Sequence (query) tiling: whole sequence if short, else 128-row tiles.
    TS = S if S <= q_tile else q_tile

    # VMEM budget from actual buffer math (weights + I/O blocks + activations).
    param_bytes = sum(int(a.size) * a.dtype.itemsize for a in args[2:])
    io_bytes = 4 * (S * D + 2 * TS * D)                    # x_full + x_tile + out
    act_bytes = 4 * (3 * S * D + TS * (S + 2 * M + 8 * D))
    vmem_limit = 2 * param_bytes + 2 * io_bytes + act_bytes + (4 << 20)
    vmem_limit = int(min(max(vmem_limit, 32 << 20), 100 << 20))

    # Advisory cost estimate for the whole call.
    flops = int(B * (2 * S * D * (3 * D + D + 2 * M) + 4 * heads * S * S * Dh))
    transcendentals = int(B * (heads * S * S + S * M))
    bytes_accessed = int(2 * B * S * D * 4 + param_bytes)
    cost = pl.CostEstimate(flops=flops, transcendentals=transcendentals,
                           bytes_accessed=bytes_accessed)

    # Prefer single-buffered weight blocks (constant index_map => no re-DMA);
    # fall back to default buffering if this JAX build rejects per-operand modes.
    if hasattr(pl, "Buffered"):
        try:
            call = _build_call(B, S, D, M, heads, TS, pl.Buffered(1),
                               vmem_limit, cost)
            return jax.block_until_ready(call(*args))
        except Exception:
            pass
    call = _build_call(B, S, D, M, heads, TS, None, vmem_limit, cost)
    return call(*args)


# --------------------------- pure-JAX reference ------------------------------ #

def reference(x, params, *, heads):
    B, S, D = x.shape
    Dh = D // heads

    def ln(v, w, b):
        mu = v.mean(-1, keepdims=True)
        var = ((v - mu) ** 2).mean(-1, keepdims=True)
        return (v - mu) / jnp.sqrt(var + 1e-5) * w + b

    xn = ln(x, params["ln1_w"], params["ln1_b"])
    qkv = xn @ params["in_proj_w"].T + params["in_proj_b"]
    q, k, v = jnp.split(qkv, 3, axis=-1)
    q = q.reshape(B, S, heads, Dh).transpose(0, 2, 1, 3) / jnp.sqrt(Dh)
    k = k.reshape(B, S, heads, Dh).transpose(0, 2, 1, 3)
    v = v.reshape(B, S, heads, Dh).transpose(0, 2, 1, 3)
    s = jnp.einsum("bhqd,bhkd->bhqk", q, k)
    p = jax.nn.softmax(s, axis=-1)
    a = jnp.einsum("bhqk,bhkd->bhqd", p, v).transpose(0, 2, 1, 3).reshape(B, S, D)
    a = a @ params["out_proj_w"].T + params["out_proj_b"]
    x1 = x + a
    xn2 = ln(x1, params["ln2_w"], params["ln2_b"])
    h = xn2 @ params["fc1_w"].T + params["fc1_b"]
    h = 0.5 * h * (1.0 + jax.lax.erf(h / jnp.sqrt(2.0)))
    m = h @ params["fc2_w"].T + params["fc2_b"]
    return x1 + m


# ---------------------------------- main ------------------------------------ #

if __name__ == "__main__":
    # Small demo shapes (perf should be benchmarked at ViT-real sizes:
    # S>=196, D>=768, M>=3072 -- these tiny shapes only exercise correctness).
    B, S, D, HEADS, M = 2, 8, 32, 4, 64

    keys = jax.random.split(jax.random.PRNGKey(0), 9)

    params = {
        "ln1_w": jnp.ones((D,), jnp.float32),
        "ln1_b": jnp.zeros((D,), jnp.float32),
        "in_proj_w": 0.05 * jax.random.normal(keys[0], (3 * D, D), jnp.float32),
        "in_proj_b": 0.01 * jax.random.normal(keys[1], (3 * D,), jnp.float32),
        "out_proj_w": 0.05 * jax.random.normal(keys[2], (D, D), jnp.float32),
        "out_proj_b": 0.01 * jax.random.normal(keys[3], (D,), jnp.float32),
        "ln2_w": jnp.ones((D,), jnp.float32),
        "ln2_b": jnp.zeros((D,), jnp.float32),
        "fc1_w": 0.05 * jax.random.normal(keys[4], (M, D), jnp.float32),
        "fc1_b": 0.01 * jax.random.normal(keys[5], (M,), jnp.float32),
        "fc2_w": 0.05 * jax.random.normal(keys[6], (D, M), jnp.float32),
        "fc2_b": 0.01 * jax.random.normal(keys[7], (D,), jnp.float32),
    }

    x = jax.random.normal(keys[8], (B, S, D), jnp.float32)

    out = transformer_encoder_layer(x, params, heads=HEADS)
    out = jax.block_until_ready(out)

    ref = reference(x, params, heads=HEADS)
    assert out.shape == (B, S, D)
    # bf16 matmul operands (f32 accumulation) + approx reciprocal => looser tol.
    max_err = float(jnp.max(jnp.abs(out.astype(jnp.float32) - ref)))
    assert jnp.allclose(out.astype(jnp.float32), ref, atol=2e-2, rtol=2e-2), max_err

    print("KERNEL_OK")
</pallas_src>

<mosaic_0001>
module attributes {stable_mosaic.version = 11 : i64} {
  func.func @encoder_layer_kernel(%arg0: i32, %arg1: i32, %arg2: memref<1x8x32xf32, #tpu.memory_space<vmem>>, %arg3: memref<1x8x32xf32, #tpu.memory_space<vmem>>, %arg4: memref<1x32xf32, #tpu.memory_space<vmem>>, %arg5: memref<1x32xf32, #tpu.memory_space<vmem>>, %arg6: memref<4x32x8xbf16, #tpu.memory_space<vmem>>, %arg7: memref<4x1x8xf32, #tpu.memory_space<vmem>>, %arg8: memref<4x32x8xbf16, #tpu.memory_space<vmem>>, %arg9: memref<4x1x8xf32, #tpu.memory_space<vmem>>, %arg10: memref<4x32x8xbf16, #tpu.memory_space<vmem>>, %arg11: memref<4x1x8xf32, #tpu.memory_space<vmem>>, %arg12: memref<4x8x32xbf16, #tpu.memory_space<vmem>>, %arg13: memref<1x32xf32, #tpu.memory_space<vmem>>, %arg14: memref<1x32xf32, #tpu.memory_space<vmem>>, %arg15: memref<1x32xf32, #tpu.memory_space<vmem>>, %arg16: memref<32x64xbf16, #tpu.memory_space<vmem>>, %arg17: memref<1x64xf32, #tpu.memory_space<vmem>>, %arg18: memref<64x32xbf16, #tpu.memory_space<vmem>>, %arg19: memref<1x32xf32, #tpu.memory_space<vmem>>, %arg20: memref<1x8x32xf32, #tpu.memory_space<vmem>>) attributes {dimension_semantics = [#tpu.dimension_semantics<parallel>, #tpu.dimension_semantics<parallel>], iteration_bounds = array<i64: 2, 1>, scalar_prefetch = 0 : i64, scratch_operands = 0 : i64, tpu.core_type = #tpu.core_type<tc>, window_params = [{transform_indices = @transform_0, window_bounds = array<i64: 1, 8, 32>}, {transform_indices = @transform_1, window_bounds = array<i64: 1, 8, 32>}, {pipeline_mode = #tpu.pipeline_mode<synchronous>, transform_indices = @transform_2, window_bounds = array<i64: 1, 32>}, {pipeline_mode = #tpu.pipeline_mode<synchronous>, transform_indices = @transform_3, window_bounds = array<i64: 1, 32>}, {pipeline_mode = #tpu.pipeline_mode<synchronous>, transform_indices = @transform_4, window_bounds = array<i64: 4, 32, 8>}, {pipeline_mode = #tpu.pipeline_mode<synchronous>, transform_indices = @transform_5, window_bounds = array<i64: 4, 1, 8>}, {pipeline_mode = #tpu.pipeline_mode<synchronous>, transform_indices = @transform_6, window_bounds = array<i64: 4, 32, 8>}, {pipeline_mode = #tpu.pipeline_mode<synchronous>, transform_indices = @transform_7, window_bounds = array<i64: 4, 1, 8>}, {pipeline_mode = #tpu.pipeline_mode<synchronous>, transform_indices = @transform_8, window_bounds = array<i64: 4, 32, 8>}, {pipeline_mode = #tpu.pipeline_mode<synchronous>, transform_indices = @transform_9, window_bounds = array<i64: 4, 1, 8>}, {pipeline_mode = #tpu.pipeline_mode<synchronous>, transform_indices = @transform_10, window_bounds = array<i64: 4, 8, 32>}, {pipeline_mode = #tpu.pipeline_mode<synchronous>, transform_indices = @transform_11, window_bounds = array<i64: 1, 32>}, {pipeline_mode = #tpu.pipeline_mode<synchronous>, transform_indices = @transform_12, window_bounds = array<i64: 1, 32>}, {pipeline_mode = #tpu.pipeline_mode<synchronous>, transform_indices = @transform_13, window_bounds = array<i64: 1, 32>}, {pipeline_mode = #tpu.pipeline_mode<synchronous>, transform_indices = @transform_14, window_bounds = array<i64: 32, 64>}, {pipeline_mode = #tpu.pipeline_mode<synchronous>, transform_indices = @transform_15, window_bounds = array<i64: 1, 64>}, {pipeline_mode = #tpu.pipeline_mode<synchronous>, transform_indices = @transform_16, window_bounds = array<i64: 64, 32>}, {pipeline_mode = #tpu.pipeline_mode<synchronous>, transform_indices = @transform_17, window_bounds = array<i64: 1, 32>}, {transform_indices = @transform_18, window_bounds = array<i64: 1, 8, 32>}]} {
    %c0 = arith.constant 0 : index
    %c0_0 = arith.constant 0 : index
    %c0_1 = arith.constant 0 : index
    %0 = vector.load %arg2[%c0, %c0_0, %c0_1] : memref<1x8x32xf32, #tpu.memory_space<vmem>>, vector<1x8x32xf32>
    %1 = vector.shape_cast %0 : vector<1x8x32xf32> to vector<8x32xf32>
    %c0_2 = arith.constant 0 : index
    %c0_3 = arith.constant 0 : index
    %c0_4 = arith.constant 0 : index
    %2 = vector.load %arg3[%c0_2, %c0_3, %c0_4] : memref<1x8x32xf32, #tpu.memory_space<vmem>>, vector<1x8x32xf32>
    %3 = vector.shape_cast %2 : vector<1x8x32xf32> to vector<8x32xf32>
    %c0_5 = arith.constant 0 : index
    %c0_6 = arith.constant 0 : index
    %4 = vector.load %arg4[%c0_5, %c0_6] : memref<1x32xf32, #tpu.memory_space<vmem>>, vector<1x32xf32>
    %5 = vector.shape_cast %4 : vector<1x32xf32> to vector<32xf32>
    %c0_7 = arith.constant 0 : index
    %c0_8 = arith.constant 0 : index
    %6 = vector.load %arg5[%c0_7, %c0_8] : memref<1x32xf32, #tpu.memory_space<vmem>>, vector<1x32xf32>
    %7 = vector.shape_cast %6 : vector<1x32xf32> to vector<32xf32>
    %cst = arith.constant dense<0.000000e+00> : vector<8xf32>
    %8 = vector.multi_reduction <add>, %1, %cst [1] : vector<8x32xf32> to vector<8xf32>
    %9 = vector.shape_cast %8 : vector<8xf32> to vector<8x1xf32>
    %cst_9 = arith.constant 3.200000e+01 : f32
    %10 = vector.broadcast %cst_9 : f32 to vector<8x1xf32>
    %11 = arith.divf %9, %10 : vector<8x1xf32>
    %12 = vector.broadcast %11 : vector<8x1xf32> to vector<8x32xf32>
    %13 = arith.subf %1, %12 : vector<8x32xf32>
    %14 = arith.mulf %13, %13 : vector<8x32xf32>
    %cst_10 = arith.constant dense<0.000000e+00> : vector<8xf32>
    %15 = vector.multi_reduction <add>, %14, %cst_10 [1] : vector<8x32xf32> to vector<8xf32>
    %16 = vector.shape_cast %15 : vector<8xf32> to vector<8x1xf32>
    %cst_11 = arith.constant 3.200000e+01 : f32
    %17 = vector.broadcast %cst_11 : f32 to vector<8x1xf32>
    %18 = arith.divf %16, %17 : vector<8x1xf32>
    %19 = vector.broadcast %11 : vector<8x1xf32> to vector<8x32xf32>
    %20 = arith.subf %1, %19 : vector<8x32xf32>
    %cst_12 = arith.constant 9.99999974E-6 : f32
    %21 = vector.broadcast %cst_12 : f32 to vector<8x1xf32>
    %22 = arith.addf %18, %21 : vector<8x1xf32>
    %23 = math.rsqrt %22 : vector<8x1xf32>
    %24 = vector.broadcast %23 : vector<8x1xf32> to vector<8x32xf32>
    %25 = arith.mulf %20, %24 : vector<8x32xf32>
    %26 = vector.shape_cast %5 : vector<32xf32> to vector<1x32xf32>
    %27 = vector.broadcast %26 : vector<1x32xf32> to vector<8x32xf32>
    %28 = arith.mulf %25, %27 : vector<8x32xf32>
    %29 = vector.shape_cast %7 : vector<32xf32> to vector<1x32xf32>
    %30 = vector.broadcast %29 : vector<1x32xf32> to vector<8x32xf32>
    %31 = arith.addf %28, %30 : vector<8x32xf32>
    %32 = arith.truncf %31 : vector<8x32xf32> to vector<8x32xbf16>
    %cst_13 = arith.constant dense<0.000000e+00> : vector<8xf32>
    %33 = vector.multi_reduction <add>, %3, %cst_13 [1] : vector<8x32xf32> to vector<8xf32>
    %34 = vector.shape_cast %33 : vector<8xf32> to vector<8x1xf32>
    %cst_14 = arith.constant 3.200000e+01 : f32
    %35 = vector.broadcast %cst_14 : f32 to vector<8x1xf32>
    %36 = arith.divf %34, %35 : vector<8x1xf32>
    %37 = vector.broadcast %36 : vector<8x1xf32> to vector<8x32xf32>
    %38 = arith.subf %3, %37 : vector<8x32xf32>
    %39 = arith.mulf %38, %38 : vector<8x32xf32>
    %cst_15 = arith.constant dense<0.000000e+00> : vector<8xf32>
    %40 = vector.multi_reduction <add>, %39, %cst_15 [1] : vector<8x32xf32> to vector<8xf32>
    %41 = vector.shape_cast %40 : vector<8xf32> to vector<8x1xf32>
    %cst_16 = arith.constant 3.200000e+01 : f32
    %42 = vector.broadcast %cst_16 : f32 to vector<8x1xf32>
    %43 = arith.divf %41, %42 : vector<8x1xf32>
    %44 = vector.broadcast %36 : vector<8x1xf32> to vector<8x32xf32>
    %45 = arith.subf %3, %44 : vector<8x32xf32>
    %cst_17 = arith.constant 9.99999974E-6 : f32
    %46 = vector.broadcast %cst_17 : f32 to vector<8x1xf32>
    %47 = arith.addf %43, %46 : vector<8x1xf32>
    %48 = math.rsqrt %47 : vector<8x1xf32>
    %49 = vector.broadcast %48 : vector<8x1xf32> to vector<8x32xf32>
    %50 = arith.mulf %45, %49 : vector<8x32xf32>
    %51 = vector.shape_cast %5 : vector<32xf32> to vector<1x32xf32>
    %52 = vector.broadcast %51 : vector<1x32xf32> to vector<8x32xf32>
    %53 = arith.mulf %50, %52 : vector<8x32xf32>
    %54 = vector.shape_cast %7 : vector<32xf32> to vector<1x32xf32>
    %55 = vector.broadcast %54 : vector<1x32xf32> to vector<8x32xf32>
    %56 = arith.addf %53, %55 : vector<8x32xf32>
    %57 = arith.truncf %56 : vector<8x32xf32> to vector<8x32xbf16>
    %cst_18 = arith.constant 0.000000e+00 : f32
    %58 = vector.broadcast %cst_18 : f32 to vector<8x32xf32>
    %c0_i32 = arith.constant 0 : i32
    %c4_i32 = arith.constant 4 : i32
    %59 = arith.addi %c0_i32, %c4_i32 : i32
    %c1_i32 = arith.constant 1 : i32
    %60 = scf.for %arg21 = %c0_i32 to %59 step %c1_i32 iter_args(%arg22 = %58) -> (vector<8x32xf32>)  : i32 {
      %123 = arith.index_cast %arg21 : i32 to index
      %c0_47 = arith.constant 0 : index
      %c0_48 = arith.constant 0 : index
      %124 = vector.load %arg6[%123, %c0_47, %c0_48] : memref<4x32x8xbf16, #tpu.memory_space<vmem>>, vector<1x32x8xbf16>
      %125 = vector.shape_cast %124 : vector<1x32x8xbf16> to vector<32x8xbf16>
      %cst_49 = arith.constant dense<0.000000e+00> : vector<8x8xf32>
      %126 = tpu.matmul %57, %125, %cst_49 {dimension_numbers = #tpu.dot_dimension_numbers<[1], [0], [0], [1], [0, 0, 1, 1], [], []>} : vector<8x32xbf16>, vector<32x8xbf16>, vector<8x8xf32> -> vector<8x8xf32>
      %127 = arith.index_cast %arg21 : i32 to index
      %c0_50 = arith.constant 0 : index
      %c0_51 = arith.constant 0 : index
      %128 = vector.load %arg7[%127, %c0_50, %c0_51] : memref<4x1x8xf32, #tpu.memory_space<vmem>>, vector<1x1x8xf32>
      %129 = vector.shape_cast %128 : vector<1x1x8xf32> to vector<1x8xf32>
      %130 = vector.broadcast %129 : vector<1x8xf32> to vector<8x8xf32>
      %131 = arith.addf %126, %130 : vector<8x8xf32>
      %132 = arith.index_cast %arg21 : i32 to index
      %c0_52 = arith.constant 0 : index
      %c0_53 = arith.constant 0 : index
      %133 = vector.load %arg8[%132, %c0_52, %c0_53] : memref<4x32x8xbf16, #tpu.memory_space<vmem>>, vector<1x32x8xbf16>
      %134 = vector.shape_cast %133 : vector<1x32x8xbf16> to vector<32x8xbf16>
      %cst_54 = arith.constant dense<0.000000e+00> : vector<8x8xf32>
      %135 = tpu.matmul %32, %134, %cst_54 {dimension_numbers = #tpu.dot_dimension_numbers<[1], [0], [0], [1], [0, 0, 1, 1], [], []>} : vector<8x32xbf16>, vector<32x8xbf16>, vector<8x8xf32> -> vector<8x8xf32>
      %136 = arith.index_cast %arg21 : i32 to index
      %c0_55 = arith.constant 0 : index
      %c0_56 = arith.constant 0 : index
      %137 = vector.load %arg9[%136, %c0_55, %c0_56] : memref<4x1x8xf32, #tpu.memory_space<vmem>>, vector<1x1x8xf32>
      %138 = vector.shape_cast %137 : vector<1x1x8xf32> to vector<1x8xf32>
      %139 = vector.broadcast %138 : vector<1x8xf32> to vector<8x8xf32>
      %140 = arith.addf %135, %139 : vector<8x8xf32>
      %141 = arith.index_cast %arg21 : i32 to index
      %c0_57 = arith.constant 0 : index
      %c0_58 = arith.constant 0 : index
      %142 = vector.load %arg10[%141, %c0_57, %c0_58] : memref<4x32x8xbf16, #tpu.memory_space<vmem>>, vector<1x32x8xbf16>
      %143 = vector.shape_cast %142 : vector<1x32x8xbf16> to vector<32x8xbf16>
      %cst_59 = arith.constant dense<0.000000e+00> : vector<8x8xf32>
      %144 = tpu.matmul %32, %143, %cst_59 {dimension_numbers = #tpu.dot_dimension_numbers<[1], [0], [0], [1], [0, 0, 1, 1], [], []>} : vector<8x32xbf16>, vector<32x8xbf16>, vector<8x8xf32> -> vector<8x8xf32>
      %145 = arith.index_cast %arg21 : i32 to index
      %c0_60 = arith.constant 0 : index
      %c0_61 = arith.constant 0 : index
      %146 = vector.load %arg11[%145, %c0_60, %c0_61] : memref<4x1x8xf32, #tpu.memory_space<vmem>>, vector<1x1x8xf32>
      %147 = vector.shape_cast %146 : vector<1x1x8xf32> to vector<1x8xf32>
      %148 = vector.broadcast %147 : vector<1x8xf32> to vector<8x8xf32>
      %149 = arith.addf %144, %148 : vector<8x8xf32>
      %150 = arith.truncf %131 : vector<8x8xf32> to vector<8x8xbf16>
      %151 = arith.truncf %140 : vector<8x8xf32> to vector<8x8xbf16>
      %152 = tpu.transpose %151, [1, 0] : vector<8x8xbf16> -> vector<8x8xbf16>
      %cst_62 = arith.constant dense<0.000000e+00> : vector<8x8xf32>
      %153 = tpu.matmul %150, %152, %cst_62 {dimension_numbers = #tpu.dot_dimension_numbers<[1], [0], [0], [1], [0, 0, 1, 1], [], []>} : vector<8x8xbf16>, vector<8x8xbf16>, vector<8x8xf32> -> vector<8x8xf32>
      %cst_63 = arith.constant dense<0xFF800000> : vector<8xf32>
      %154 = vector.multi_reduction <maximumf>, %153, %cst_63 [1] : vector<8x8xf32> to vector<8xf32>
      %155 = vector.shape_cast %154 : vector<8xf32> to vector<8x1xf32>
      %156 = vector.broadcast %155 : vector<8x1xf32> to vector<8x8xf32>
      %157 = arith.subf %153, %156 : vector<8x8xf32>
      %158 = math.exp %157 : vector<8x8xf32>
      %cst_64 = arith.constant dense<0.000000e+00> : vector<8xf32>
      %159 = vector.multi_reduction <add>, %158, %cst_64 [1] : vector<8x8xf32> to vector<8xf32>
      %160 = vector.shape_cast %159 : vector<8xf32> to vector<8x1xf32>
      %161 = tpu.reciprocal %160 {approx = true} : vector<8x1xf32> -> vector<8x1xf32>
      %162 = vector.broadcast %161 : vector<8x1xf32> to vector<8x8xf32>
      %163 = arith.mulf %158, %162 : vector<8x8xf32>
      %164 = arith.truncf %163 : vector<8x8xf32> to vector<8x8xbf16>
      %165 = arith.truncf %149 : vector<8x8xf32> to vector<8x8xbf16>
      %cst_65 = arith.constant dense<0.000000e+00> : vector<8x8xf32>
      %166 = tpu.matmul %164, %165, %cst_65 {dimension_numbers = #tpu.dot_dimension_numbers<[1], [0], [0], [1], [0, 0, 1, 1], [], []>} : vector<8x8xbf16>, vector<8x8xbf16>, vector<8x8xf32> -> vector<8x8xf32>
      %167 = arith.truncf %166 : vector<8x8xf32> to vector<8x8xbf16>
      %168 = arith.index_cast %arg21 : i32 to index
      %c0_66 = arith.constant 0 : index
      %c0_67 = arith.constant 0 : index
      %169 = vector.load %arg12[%168, %c0_66, %c0_67] : memref<4x8x32xbf16, #tpu.memory_space<vmem>>, vector<1x8x32xbf16>
      %170 = vector.shape_cast %169 : vector<1x8x32xbf16> to vector<8x32xbf16>
      %cst_68 = arith.constant dense<0.000000e+00> : vector<8x32xf32>
      %171 = tpu.matmul %167, %170, %cst_68 {dimension_numbers = #tpu.dot_dimension_numbers<[1], [0], [0], [1], [0, 0, 1, 1], [], []>} : vector<8x8xbf16>, vector<8x32xbf16>, vector<8x32xf32> -> vector<8x32xf32>
      %172 = arith.addf %arg22, %171 : vector<8x32xf32>
      scf.yield %172 : vector<8x32xf32>
    }
    %c4_i32_19 = arith.constant 4 : i32
    %c0_20 = arith.constant 0 : index
    %c0_21 = arith.constant 0 : index
    %61 = vector.load %arg13[%c0_20, %c0_21] : memref<1x32xf32, #tpu.memory_space<vmem>>, vector<1x32xf32>
    %62 = vector.shape_cast %61 : vector<1x32xf32> to vector<32xf32>
    %63 = vector.shape_cast %62 : vector<32xf32> to vector<1x32xf32>
    %64 = vector.broadcast %63 : vector<1x32xf32> to vector<8x32xf32>
    %65 = arith.addf %60, %64 : vector<8x32xf32>
    %66 = arith.addf %3, %65 : vector<8x32xf32>
    %c0_22 = arith.constant 0 : index
    %c0_23 = arith.constant 0 : index
    %67 = vector.load %arg14[%c0_22, %c0_23] : memref<1x32xf32, #tpu.memory_space<vmem>>, vector<1x32xf32>
    %68 = vector.shape_cast %67 : vector<1x32xf32> to vector<32xf32>
    %c0_24 = arith.constant 0 : index
    %c0_25 = arith.constant 0 : index
    %69 = vector.load %arg15[%c0_24, %c0_25] : memref<1x32xf32, #tpu.memory_space<vmem>>, vector<1x32xf32>
    %70 = vector.shape_cast %69 : vector<1x32xf32> to vector<32xf32>
    %cst_26 = arith.constant dense<0.000000e+00> : vector<8xf32>
    %71 = vector.multi_reduction <add>, %66, %cst_26 [1] : vector<8x32xf32> to vector<8xf32>
    %72 = vector.shape_cast %71 : vector<8xf32> to vector<8x1xf32>
    %cst_27 = arith.constant 3.200000e+01 : f32
    %73 = vector.broadcast %cst_27 : f32 to vector<8x1xf32>
    %74 = arith.divf %72, %73 : vector<8x1xf32>
    %75 = vector.broadcast %74 : vector<8x1xf32> to vector<8x32xf32>
    %76 = arith.subf %66, %75 : vector<8x32xf32>
    %77 = arith.mulf %76, %76 : vector<8x32xf32>
    %cst_28 = arith.constant dense<0.000000e+00> : vector<8xf32>
    %78 = vector.multi_reduction <add>, %77, %cst_28 [1] : vector<8x32xf32> to vector<8xf32>
    %79 = vector.shape_cast %78 : vector<8xf32> to vector<8x1xf32>
    %cst_29 = arith.constant 3.200000e+01 : f32
    %80 = vector.broadcast %cst_29 : f32 to vector<8x1xf32>
    %81 = arith.divf %79, %80 : vector<8x1xf32>
    %82 = vector.broadcast %74 : vector<8x1xf32> to vector<8x32xf32>
    %83 = arith.subf %66, %82 : vector<8x32xf32>
    %cst_30 = arith.constant 9.99999974E-6 : f32
    %84 = vector.broadcast %cst_30 : f32 to vector<8x1xf32>
    %85 = arith.addf %81, %84 : vector<8x1xf32>
    %86 = math.rsqrt %85 : vector<8x1xf32>
    %87 = vector.broadcast %86 : vector<8x1xf32> to vector<8x32xf32>
    %88 = arith.mulf %83, %87 : vector<8x32xf32>
    %89 = vector.shape_cast %68 : vector<32xf32> to vector<1x32xf32>
    %90 = vector.broadcast %89 : vector<1x32xf32> to vector<8x32xf32>
    %91 = arith.mulf %88, %90 : vector<8x32xf32>
    %92 = vector.shape_cast %70 : vector<32xf32> to vector<1x32xf32>
    %93 = vector.broadcast %92 : vector<1x32xf32> to vector<8x32xf32>
    %94 = arith.addf %91, %93 : vector<8x32xf32>
    %95 = arith.truncf %94 : vector<8x32xf32> to vector<8x32xbf16>
    %c0_31 = arith.constant 0 : index
    %c0_32 = arith.constant 0 : index
    %96 = vector.load %arg16[%c0_31, %c0_32] : memref<32x64xbf16, #tpu.memory_space<vmem>>, vector<32x64xbf16>
    %cst_33 = arith.constant dense<0.000000e+00> : vector<8x64xf32>
    %97 = tpu.matmul %95, %96, %cst_33 {dimension_numbers = #tpu.dot_dimension_numbers<[1], [0], [0], [1], [0, 0, 1, 1], [], []>} : vector<8x32xbf16>, vector<32x64xbf16>, vector<8x64xf32> -> vector<8x64xf32>
    %c0_34 = arith.constant 0 : index
    %c0_35 = arith.constant 0 : index
    %98 = vector.load %arg17[%c0_34, %c0_35] : memref<1x64xf32, #tpu.memory_space<vmem>>, vector<1x64xf32>
    %99 = vector.shape_cast %98 : vector<1x64xf32> to vector<64xf32>
    %100 = vector.shape_cast %99 : vector<64xf32> to vector<1x64xf32>
    %101 = vector.broadcast %100 : vector<1x64xf32> to vector<8x64xf32>
    %102 = arith.addf %97, %101 : vector<8x64xf32>
    %cst_36 = arith.constant 5.000000e-01 : f32
    %103 = vector.broadcast %cst_36 : f32 to vector<8x64xf32>
    %104 = arith.mulf %103, %102 : vector<8x64xf32>
    %cst_37 = arith.constant 0.707106769 : f32
    %105 = vector.broadcast %cst_37 : f32 to vector<8x64xf32>
    %106 = arith.mulf %102, %105 : vector<8x64xf32>
    %107 = math.erf %106 : vector<8x64xf32>
    %cst_38 = arith.constant 1.000000e+00 : f32
    %108 = vector.broadcast %cst_38 : f32 to vector<8x64xf32>
    %109 = arith.addf %108, %107 : vector<8x64xf32>
    %110 = arith.mulf %104, %109 : vector<8x64xf32>
    %111 = arith.truncf %110 : vector<8x64xf32> to vector<8x64xbf16>
    %c0_39 = arith.constant 0 : index
    %c0_40 = arith.constant 0 : index
    %112 = vector.load %arg18[%c0_39, %c0_40] : memref<64x32xbf16, #tpu.memory_space<vmem>>, vector<64x32xbf16>
    %cst_41 = arith.constant dense<0.000000e+00> : vector<8x32xf32>
    %113 = tpu.matmul %111, %112, %cst_41 {dimension_numbers = #tpu.dot_dimension_numbers<[1], [0], [0], [1], [0, 0, 1, 1], [], []>} : vector<8x64xbf16>, vector<64x32xbf16>, vector<8x32xf32> -> vector<8x32xf32>
    %c0_42 = arith.constant 0 : index
    %c0_43 = arith.constant 0 : index
    %114 = vector.load %arg19[%c0_42, %c0_43] : memref<1x32xf32, #tpu.memory_space<vmem>>, vector<1x32xf32>
    %115 = vector.shape_cast %114 : vector<1x32xf32> to vector<32xf32>
    %116 = vector.shape_cast %115 : vector<32xf32> to vector<1x32xf32>
    %117 = vector.broadcast %116 : vector<1x32xf32> to vector<8x32xf32>
    %118 = arith.addf %113, %117 : vector<8x32xf32>
    %119 = arith.addf %66, %118 : vector<8x32xf32>
    %c0_44 = arith.constant 0 : index
    %c0_45 = arith.constant 0 : index
    %c0_46 = arith.constant 0 : index
    %120 = vector.load %arg20[%c0_44, %c0_45, %c0_46] : memref<1x8x32xf32, #tpu.memory_space<vmem>>, vector<1x8x32xf32>
    %121 = vector.shape_cast %120 : vector<1x8x32xf32> to vector<8x32xf32>
    %122 = vector.shape_cast %119 : vector<8x32xf32> to vector<1x8x32xf32>
    tpu.vector_store %arg20[%c0_44, %c0_45, %c0_46], %122 {strides = array<i32>} : memref<1x8x32xf32, #tpu.memory_space<vmem>>, vector<1x8x32xf32>,
    return
  }
  func.func @transform_0(%arg0: i32, %arg1: i32) -> (i32, i32, i32) {
    %c0_i32 = arith.constant 0 : i32
    %c0_i32_0 = arith.constant 0 : i32
    %c0_i32_1 = arith.constant 0 : i32
    return %arg0, %c0_i32, %c0_i32_0 : i32, i32, i32
  }
  func.func @transform_1(%arg0: i32, %arg1: i32) -> (i32, i32, i32) {
    %c0_i32 = arith.constant 0 : i32
    %c0_i32_0 = arith.constant 0 : i32
    return %arg0, %arg1, %c0_i32 : i32, i32, i32
  }
  func.func @transform_2(%arg0: i32, %arg1: i32) -> (i32, i32) {
    %c0_i32 = arith.constant 0 : i32
    %c0_i32_0 = arith.constant 0 : i32
    %c0_i32_1 = arith.constant 0 : i32
    return %c0_i32, %c0_i32_0 : i32, i32
  }
  func.func @transform_3(%arg0: i32, %arg1: i32) -> (i32, i32) {
    %c0_i32 = arith.constant 0 : i32
    %c0_i32_0 = arith.constant 0 : i32
    %c0_i32_1 = arith.constant 0 : i32
    return %c0_i32, %c0_i32_0 : i32, i32
  }
  func.func @transform_4(%arg0: i32, %arg1: i32) -> (i32, i32, i32) {
    %c0_i32 = arith.constant 0 : i32
    %c0_i32_0 = arith.constant 0 : i32
    %c0_i32_1 = arith.constant 0 : i32
    %c0_i32_2 = arith.constant 0 : i32
    return %c0_i32, %c0_i32_0, %c0_i32_1 : i32, i32, i32
  }
  func.func @transform_5(%arg0: i32, %arg1: i32) -> (i32, i32, i32) {
    %c0_i32 = arith.constant 0 : i32
    %c0_i32_0 = arith.constant 0 : i32
    %c0_i32_1 = arith.constant 0 : i32
    %c0_i32_2 = arith.constant 0 : i32
    return %c0_i32, %c0_i32_0, %c0_i32_1 : i32, i32, i32
  }
  func.func @transform_6(%arg0: i32, %arg1: i32) -> (i32, i32, i32) {
    %c0_i32 = arith.constant 0 : i32
    %c0_i32_0 = arith.constant 0 : i32
    %c0_i32_1 = arith.constant 0 : i32
    %c0_i32_2 = arith.constant 0 : i32
    return %c0_i32, %c0_i32_0, %c0_i32_1 : i32, i32, i32
  }
  func.func @transform_7(%arg0: i32, %arg1: i32) -> (i32, i32, i32) {
    %c0_i32 = arith.constant 0 : i32
    %c0_i32_0 = arith.constant 0 : i32
    %c0_i32_1 = arith.constant 0 : i32
    %c0_i32_2 = arith.constant 0 : i32
    return %c0_i32, %c0_i32_0, %c0_i32_1 : i32, i32, i32
  }
  func.func @transform_8(%arg0: i32, %arg1: i32) -> (i32, i32, i32) {
    %c0_i32 = arith.constant 0 : i32
    %c0_i32_0 = arith.constant 0 : i32
    %c0_i32_1 = arith.constant 0 : i32
    %c0_i32_2 = arith.constant 0 : i32
    return %c0_i32, %c0_i32_0, %c0_i32_1 : i32, i32, i32
  }
  func.func @transform_9(%arg0: i32, %arg1: i32) -> (i32, i32, i32) {
    %c0_i32 = arith.constant 0 : i32
    %c0_i32_0 = arith.constant 0 : i32
    %c0_i32_1 = arith.constant 0 : i32
    %c0_i32_2 = arith.constant 0 : i32
    return %c0_i32, %c0_i32_0, %c0_i32_1 : i32, i32, i32
  }
  func.func @transform_10(%arg0: i32, %arg1: i32) -> (i32, i32, i32) {
    %c0_i32 = arith.constant 0 : i32
    %c0_i32_0 = arith.constant 0 : i32
    %c0_i32_1 = arith.constant 0 : i32
    %c0_i32_2 = arith.constant 0 : i32
    return %c0_i32, %c0_i32_0, %c0_i32_1 : i32, i32, i32
  }
  func.func @transform_11(%arg0: i32, %arg1: i32) -> (i32, i32) {
    %c0_i32 = arith.constant 0 : i32
    %c0_i32_0 = arith.constant 0 : i32
    %c0_i32_1 = arith.constant 0 : i32
    return %c0_i32, %c0_i32_0 : i32, i32
  }
  func.func @transform_12(%arg0: i32, %arg1: i32) -> (i32, i32) {
    %c0_i32 = arith.constant 0 : i32
    %c0_i32_0 = arith.constant 0 : i32
    %c0_i32_1 = arith.constant 0 : i32
    return %c0_i32, %c0_i32_0 : i32, i32
  }
  func.func @transform_13(%arg0: i32, %arg1: i32) -> (i32, i32) {
    %c0_i32 = arith.constant 0 : i32
    %c0_i32_0 = arith.constant 0 : i32
    %c0_i32_1 = arith.constant 0 : i32
    return %c0_i32, %c0_i32_0 : i32, i32
  }
  func.func @transform_14(%arg0: i32, %arg1: i32) -> (i32, i32) {
    %c0_i32 = arith.constant 0 : i32
    %c0_i32_0 = arith.constant 0 : i32
    %c0_i32_1 = arith.constant 0 : i32
    return %c0_i32, %c0_i32_0 : i32, i32
  }
  func.func @transform_15(%arg0: i32, %arg1: i32) -> (i32, i32) {
    %c0_i32 = arith.constant 0 : i32
    %c0_i32_0 = arith.constant 0 : i32
    %c0_i32_1 = arith.constant 0 : i32
    return %c0_i32, %c0_i32_0 : i32, i32
  }
  func.func @transform_16(%arg0: i32, %arg1: i32) -> (i32, i32) {
    %c0_i32 = arith.constant 0 : i32
    %c0_i32_0 = arith.constant 0 : i32
    %c0_i32_1 = arith.constant 0 : i32
    return %c0_i32, %c0_i32_0 : i32, i32
  }
  func.func @transform_17(%arg0: i32, %arg1: i32) -> (i32, i32) {
    %c0_i32 = arith.constant 0 : i32
    %c0_i32_0 = arith.constant 0 : i32
    %c0_i32_1 = arith.constant 0 : i32
    return %c0_i32, %c0_i32_0 : i32, i32
  }
  func.func @transform_18(%arg0: i32, %arg1: i32) -> (i32, i32, i32) {
    %c0_i32 = arith.constant 0 : i32
    %c0_i32_0 = arith.constant 0 : i32
    return %arg0, %arg1, %c0_i32 : i32, i32, i32
  }
}

module attributes {stable_mosaic.version = 11 : i64} {
  func.func @encoder_layer_kernel(%arg0: i32, %arg1: i32, %arg2: memref<1x8x32xf32, #tpu.memory_space<vmem>>, %arg3: memref<1x8x32xf32, #tpu.memory_space<vmem>>, %arg4: memref<1x32xf32, #tpu.memory_space<vmem>>, %arg5: memref<1x32xf32, #tpu.memory_space<vmem>>, %arg6: memref<4x32x8xbf16, #tpu.memory_space<vmem>>, %arg7: memref<4x1x8xf32, #tpu.memory_space<vmem>>, %arg8: memref<4x32x8xbf16, #tpu.memory_space<vmem>>, %arg9: memref<4x1x8xf32, #tpu.memory_space<vmem>>, %arg10: memref<4x32x8xbf16, #tpu.memory_space<vmem>>, %arg11: memref<4x1x8xf32, #tpu.memory_space<vmem>>, %arg12: memref<4x8x32xbf16, #tpu.memory_space<vmem>>, %arg13: memref<1x32xf32, #tpu.memory_space<vmem>>, %arg14: memref<1x32xf32, #tpu.memory_space<vmem>>, %arg15: memref<1x32xf32, #tpu.memory_space<vmem>>, %arg16: memref<32x64xbf16, #tpu.memory_space<vmem>>, %arg17: memref<1x64xf32, #tpu.memory_space<vmem>>, %arg18: memref<64x32xbf16, #tpu.memory_space<vmem>>, %arg19: memref<1x32xf32, #tpu.memory_space<vmem>>, %arg20: memref<1x8x32xf32, #tpu.memory_space<vmem>>) attributes {dimension_semantics = [#tpu.dimension_semantics<parallel>, #tpu.dimension_semantics<parallel>], iteration_bounds = array<i64: 2, 1>, scalar_prefetch = 0 : i64, scratch_operands = 0 : i64, tpu.core_type = #tpu.core_type<tc>, window_params = [{transform_indices = @transform_0, window_bounds = array<i64: 1, 8, 32>}, {transform_indices = @transform_1, window_bounds = array<i64: 1, 8, 32>}, {pipeline_mode = #tpu.pipeline_mode<synchronous>, transform_indices = @transform_2, window_bounds = array<i64: 1, 32>}, {pipeline_mode = #tpu.pipeline_mode<synchronous>, transform_indices = @transform_3, window_bounds = array<i64: 1, 32>}, {pipeline_mode = #tpu.pipeline_mode<synchronous>, transform_indices = @transform_4, window_bounds = array<i64: 4, 32, 8>}, {pipeline_mode = #tpu.pipeline_mode<synchronous>, transform_indices = @transform_5, window_bounds = array<i64: 4, 1, 8>}, {pipeline_mode = #tpu.pipeline_mode<synchronous>, transform_indices = @transform_6, window_bounds = array<i64: 4, 32, 8>}, {pipeline_mode = #tpu.pipeline_mode<synchronous>, transform_indices = @transform_7, window_bounds = array<i64: 4, 1, 8>}, {pipeline_mode = #tpu.pipeline_mode<synchronous>, transform_indices = @transform_8, window_bounds = array<i64: 4, 32, 8>}, {pipeline_mode = #tpu.pipeline_mode<synchronous>, transform_indices = @transform_9, window_bounds = array<i64: 4, 1, 8>}, {pipeline_mode = #tpu.pipeline_mode<synchronous>, transform_indices = @transform_10, window_bounds = array<i64: 4, 8, 32>}, {pipeline_mode = #tpu.pipeline_mode<synchronous>, transform_indices = @transform_11, window_bounds = array<i64: 1, 32>}, {pipeline_mode = #tpu.pipeline_mode<synchronous>, transform_indices = @transform_12, window_bounds = array<i64: 1, 32>}, {pipeline_mode = #tpu.pipeline_mode<synchronous>, transform_indices = @transform_13, window_bounds = array<i64: 1, 32>}, {pipeline_mode = #tpu.pipeline_mode<synchronous>, transform_indices = @transform_14, window_bounds = array<i64: 32, 64>}, {pipeline_mode = #tpu.pipeline_mode<synchronous>, transform_indices = @transform_15, window_bounds = array<i64: 1, 64>}, {pipeline_mode = #tpu.pipeline_mode<synchronous>, transform_indices = @transform_16, window_bounds = array<i64: 64, 32>}, {pipeline_mode = #tpu.pipeline_mode<synchronous>, transform_indices = @transform_17, window_bounds = array<i64: 1, 32>}, {transform_indices = @transform_18, window_bounds = array<i64: 1, 8, 32>}]} {
    %c0 = arith.constant 0 : index
    %c0_0 = arith.constant 0 : index
    %c0_1 = arith.constant 0 : index
    %0 = vector.load %arg2[%c0, %c0_0, %c0_1] : memref<1x8x32xf32, #tpu.memory_space<vmem>>, vector<1x8x32xf32>
    %1 = vector.shape_cast %0 : vector<1x8x32xf32> to vector<8x32xf32>
    %c0_2 = arith.constant 0 : index
    %c0_3 = arith.constant 0 : index
    %c0_4 = arith.constant 0 : index
    %2 = vector.load %arg3[%c0_2, %c0_3, %c0_4] : memref<1x8x32xf32, #tpu.memory_space<vmem>>, vector<1x8x32xf32>
    %3 = vector.shape_cast %2 : vector<1x8x32xf32> to vector<8x32xf32>
    %c0_5 = arith.constant 0 : index
    %c0_6 = arith.constant 0 : index
    %4 = vector.load %arg4[%c0_5, %c0_6] : memref<1x32xf32, #tpu.memory_space<vmem>>, vector<1x32xf32>
    %5 = vector.shape_cast %4 : vector<1x32xf32> to vector<32xf32>
    %c0_7 = arith.constant 0 : index
    %c0_8 = arith.constant 0 : index
    %6 = vector.load %arg5[%c0_7, %c0_8] : memref<1x32xf32, #tpu.memory_space<vmem>>, vector<1x32xf32>
    %7 = vector.shape_cast %6 : vector<1x32xf32> to vector<32xf32>
    %cst = arith.constant dense<0.000000e+00> : vector<8xf32>
    %8 = vector.multi_reduction <add>, %1, %cst [1] : vector<8x32xf32> to vector<8xf32>
    %9 = vector.shape_cast %8 : vector<8xf32> to vector<8x1xf32>
    %cst_9 = arith.constant 3.200000e+01 : f32
    %10 = vector.broadcast %cst_9 : f32 to vector<8x1xf32>
    %11 = arith.divf %9, %10 : vector<8x1xf32>
    %12 = vector.broadcast %11 : vector<8x1xf32> to vector<8x32xf32>
    %13 = arith.subf %1, %12 : vector<8x32xf32>
    %14 = arith.mulf %13, %13 : vector<8x32xf32>
    %cst_10 = arith.constant dense<0.000000e+00> : vector<8xf32>
    %15 = vector.multi_reduction <add>, %14, %cst_10 [1] : vector<8x32xf32> to vector<8xf32>
    %16 = vector.shape_cast %15 : vector<8xf32> to vector<8x1xf32>
    %cst_11 = arith.constant 3.200000e+01 : f32
    %17 = vector.broadcast %cst_11 : f32 to vector<8x1xf32>
    %18 = arith.divf %16, %17 : vector<8x1xf32>
    %19 = vector.broadcast %11 : vector<8x1xf32> to vector<8x32xf32>
    %20 = arith.subf %1, %19 : vector<8x32xf32>
    %cst_12 = arith.constant 9.99999974E-6 : f32
    %21 = vector.broadcast %cst_12 : f32 to vector<8x1xf32>
    %22 = arith.addf %18, %21 : vector<8x1xf32>
    %23 = math.rsqrt %22 : vector<8x1xf32>
    %24 = vector.broadcast %23 : vector<8x1xf32> to vector<8x32xf32>
    %25 = arith.mulf %20, %24 : vector<8x32xf32>
    %26 = vector.shape_cast %5 : vector<32xf32> to vector<1x32xf32>
    %27 = vector.broadcast %26 : vector<1x32xf32> to vector<8x32xf32>
    %28 = arith.mulf %25, %27 : vector<8x32xf32>
    %29 = vector.shape_cast %7 : vector<32xf32> to vector<1x32xf32>
    %30 = vector.broadcast %29 : vector<1x32xf32> to vector<8x32xf32>
    %31 = arith.addf %28, %30 : vector<8x32xf32>
    %32 = arith.truncf %31 : vector<8x32xf32> to vector<8x32xbf16>
    %cst_13 = arith.constant dense<0.000000e+00> : vector<8xf32>
    %33 = vector.multi_reduction <add>, %3, %cst_13 [1] : vector<8x32xf32> to vector<8xf32>
    %34 = vector.shape_cast %33 : vector<8xf32> to vector<8x1xf32>
    %cst_14 = arith.constant 3.200000e+01 : f32
    %35 = vector.broadcast %cst_14 : f32 to vector<8x1xf32>
    %36 = arith.divf %34, %35 : vector<8x1xf32>
    %37 = vector.broadcast %36 : vector<8x1xf32> to vector<8x32xf32>
    %38 = arith.subf %3, %37 : vector<8x32xf32>
    %39 = arith.mulf %38, %38 : vector<8x32xf32>
    %cst_15 = arith.constant dense<0.000000e+00> : vector<8xf32>
    %40 = vector.multi_reduction <add>, %39, %cst_15 [1] : vector<8x32xf32> to vector<8xf32>
    %41 = vector.shape_cast %40 : vector<8xf32> to vector<8x1xf32>
    %cst_16 = arith.constant 3.200000e+01 : f32
    %42 = vector.broadcast %cst_16 : f32 to vector<8x1xf32>
    %43 = arith.divf %41, %42 : vector<8x1xf32>
    %44 = vector.broadcast %36 : vector<8x1xf32> to vector<8x32xf32>
    %45 = arith.subf %3, %44 : vector<8x32xf32>
    %cst_17 = arith.constant 9.99999974E-6 : f32
    %46 = vector.broadcast %cst_17 : f32 to vector<8x1xf32>
    %47 = arith.addf %43, %46 : vector<8x1xf32>
    %48 = math.rsqrt %47 : vector<8x1xf32>
    %49 = vector.broadcast %48 : vector<8x1xf32> to vector<8x32xf32>
    %50 = arith.mulf %45, %49 : vector<8x32xf32>
    %51 = vector.shape_cast %5 : vector<32xf32> to vector<1x32xf32>
    %52 = vector.broadcast %51 : vector<1x32xf32> to vector<8x32xf32>
    %53 = arith.mulf %50, %52 : vector<8x32xf32>
    %54 = vector.shape_cast %7 : vector<32xf32> to vector<1x32xf32>
    %55 = vector.broadcast %54 : vector<1x32xf32> to vector<8x32xf32>
    %56 = arith.addf %53, %55 : vector<8x32xf32>
    %57 = arith.truncf %56 : vector<8x32xf32> to vector<8x32xbf16>
    %cst_18 = arith.constant 0.000000e+00 : f32
    %58 = vector.broadcast %cst_18 : f32 to vector<8x32xf32>
    %c0_i32 = arith.constant 0 : i32
    %c4_i32 = arith.constant 4 : i32
    %59 = arith.addi %c0_i32, %c4_i32 : i32
    %c1_i32 = arith.constant 1 : i32
    %60 = scf.for %arg21 = %c0_i32 to %59 step %c1_i32 iter_args(%arg22 = %58) -> (vector<8x32xf32>)  : i32 {
      %123 = arith.index_cast %arg21 : i32 to index
      %c0_47 = arith.constant 0 : index
      %c0_48 = arith.constant 0 : index
      %124 = vector.load %arg6[%123, %c0_47, %c0_48] : memref<4x32x8xbf16, #tpu.memory_space<vmem>>, vector<1x32x8xbf16>
      %125 = vector.shape_cast %124 : vector<1x32x8xbf16> to vector<32x8xbf16>
      %cst_49 = arith.constant dense<0.000000e+00> : vector<8x8xf32>
      %126 = tpu.matmul %57, %125, %cst_49 {dimension_numbers = #tpu.dot_dimension_numbers<[1], [0], [0], [1], [0, 0, 1, 1], [], []>} : vector<8x32xbf16>, vector<32x8xbf16>, vector<8x8xf32> -> vector<8x8xf32>
      %127 = arith.index_cast %arg21 : i32 to index
      %c0_50 = arith.constant 0 : index
      %c0_51 = arith.constant 0 : index
      %128 = vector.load %arg7[%127, %c0_50, %c0_51] : memref<4x1x8xf32, #tpu.memory_space<vmem>>, vector<1x1x8xf32>
      %129 = vector.shape_cast %128 : vector<1x1x8xf32> to vector<1x8xf32>
      %130 = vector.broadcast %129 : vector<1x8xf32> to vector<8x8xf32>
      %131 = arith.addf %126, %130 : vector<8x8xf32>
      %132 = arith.index_cast %arg21 : i32 to index
      %c0_52 = arith.constant 0 : index
      %c0_53 = arith.constant 0 : index
      %133 = vector.load %arg8[%132, %c0_52, %c0_53] : memref<4x32x8xbf16, #tpu.memory_space<vmem>>, vector<1x32x8xbf16>
      %134 = vector.shape_cast %133 : vector<1x32x8xbf16> to vector<32x8xbf16>
      %cst_54 = arith.constant dense<0.000000e+00> : vector<8x8xf32>
      %135 = tpu.matmul %32, %134, %cst_54 {dimension_numbers = #tpu.dot_dimension_numbers<[1], [0], [0], [1], [0, 0, 1, 1], [], []>} : vector<8x32xbf16>, vector<32x8xbf16>, vector<8x8xf32> -> vector<8x8xf32>
      %136 = arith.index_cast %arg21 : i32 to index
      %c0_55 = arith.constant 0 : index
      %c0_56 = arith.constant 0 : index
      %137 = vector.load %arg9[%136, %c0_55, %c0_56] : memref<4x1x8xf32, #tpu.memory_space<vmem>>, vector<1x1x8xf32>
      %138 = vector.shape_cast %137 : vector<1x1x8xf32> to vector<1x8xf32>
      %139 = vector.broadcast %138 : vector<1x8xf32> to vector<8x8xf32>
      %140 = arith.addf %135, %139 : vector<8x8xf32>
      %141 = arith.index_cast %arg21 : i32 to index
      %c0_57 = arith.constant 0 : index
      %c0_58 = arith.constant 0 : index
      %142 = vector.load %arg10[%141, %c0_57, %c0_58] : memref<4x32x8xbf16, #tpu.memory_space<vmem>>, vector<1x32x8xbf16>
      %143 = vector.shape_cast %142 : vector<1x32x8xbf16> to vector<32x8xbf16>
      %cst_59 = arith.constant dense<0.000000e+00> : vector<8x8xf32>
      %144 = tpu.matmul %32, %143, %cst_59 {dimension_numbers = #tpu.dot_dimension_numbers<[1], [0], [0], [1], [0, 0, 1, 1], [], []>} : vector<8x32xbf16>, vector<32x8xbf16>, vector<8x8xf32> -> vector<8x8xf32>
      %145 = arith.index_cast %arg21 : i32 to index
      %c0_60 = arith.constant 0 : index
      %c0_61 = arith.constant 0 : index
      %146 = vector.load %arg11[%145, %c0_60, %c0_61] : memref<4x1x8xf32, #tpu.memory_space<vmem>>, vector<1x1x8xf32>
      %147 = vector.shape_cast %146 : vector<1x1x8xf32> to vector<1x8xf32>
      %148 = vector.broadcast %147 : vector<1x8xf32> to vector<8x8xf32>
      %149 = arith.addf %144, %148 : vector<8x8xf32>
      %150 = arith.truncf %131 : vector<8x8xf32> to vector<8x8xbf16>
      %151 = arith.truncf %140 : vector<8x8xf32> to vector<8x8xbf16>
      %152 = tpu.transpose %151, [1, 0] : vector<8x8xbf16> -> vector<8x8xbf16>
      %cst_62 = arith.constant dense<0.000000e+00> : vector<8x8xf32>
      %153 = tpu.matmul %150, %152, %cst_62 {dimension_numbers = #tpu.dot_dimension_numbers<[1], [0], [0], [1], [0, 0, 1, 1], [], []>} : vector<8x8xbf16>, vector<8x8xbf16>, vector<8x8xf32> -> vector<8x8xf32>
      %cst_63 = arith.constant dense<0xFF800000> : vector<8xf32>
      %154 = vector.multi_reduction <maximumf>, %153, %cst_63 [1] : vector<8x8xf32> to vector<8xf32>
      %155 = vector.shape_cast %154 : vector<8xf32> to vector<8x1xf32>
      %156 = vector.broadcast %155 : vector<8x1xf32> to vector<8x8xf32>
      %157 = arith.subf %153, %156 : vector<8x8xf32>
      %158 = math.exp %157 : vector<8x8xf32>
      %cst_64 = arith.constant dense<0.000000e+00> : vector<8xf32>
      %159 = vector.multi_reduction <add>, %158, %cst_64 [1] : vector<8x8xf32> to vector<8xf32>
      %160 = vector.shape_cast %159 : vector<8xf32> to vector<8x1xf32>
      %161 = tpu.reciprocal %160 {approx = true} : vector<8x1xf32> -> vector<8x1xf32>
      %162 = vector.broadcast %161 : vector<8x1xf32> to vector<8x8xf32>
      %163 = arith.mulf %158, %162 : vector<8x8xf32>
      %164 = arith.truncf %163 : vector<8x8xf32> to vector<8x8xbf16>
      %165 = arith.truncf %149 : vector<8x8xf32> to vector<8x8xbf16>
      %cst_65 = arith.constant dense<0.000000e+00> : vector<8x8xf32>
      %166 = tpu.matmul %164, %165, %cst_65 {dimension_numbers = #tpu.dot_dimension_numbers<[1], [0], [0], [1], [0, 0, 1, 1], [], []>} : vector<8x8xbf16>, vector<8x8xbf16>, vector<8x8xf32> -> vector<8x8xf32>
      %167 = arith.truncf %166 : vector<8x8xf32> to vector<8x8xbf16>
      %168 = arith.index_cast %arg21 : i32 to index
      %c0_66 = arith.constant 0 : index
      %c0_67 = arith.constant 0 : index
      %169 = vector.load %arg12[%168, %c0_66, %c0_67] : memref<4x8x32xbf16, #tpu.memory_space<vmem>>, vector<1x8x32xbf16>
      %170 = vector.shape_cast %169 : vector<1x8x32xbf16> to vector<8x32xbf16>
      %cst_68 = arith.constant dense<0.000000e+00> : vector<8x32xf32>
      %171 = tpu.matmul %167, %170, %cst_68 {dimension_numbers = #tpu.dot_dimension_numbers<[1], [0], [0], [1], [0, 0, 1, 1], [], []>} : vector<8x8xbf16>, vector<8x32xbf16>, vector<8x32xf32> -> vector<8x32xf32>
      %172 = arith.addf %arg22, %171 : vector<8x32xf32>
      scf.yield %172 : vector<8x32xf32>
    }
    %c4_i32_19 = arith.constant 4 : i32
    %c0_20 = arith.constant 0 : index
    %c0_21 = arith.constant 0 : index
    %61 = vector.load %arg13[%c0_20, %c0_21] : memref<1x32xf32, #tpu.memory_space<vmem>>, vector<1x32xf32>
    %62 = vector.shape_cast %61 : vector<1x32xf32> to vector<32xf32>
    %63 = vector.shape_cast %62 : vector<32xf32> to vector<1x32xf32>
    %64 = vector.broadcast %63 : vector<1x32xf32> to vector<8x32xf32>
    %65 = arith.addf %60, %64 : vector<8x32xf32>
    %66 = arith.addf %3, %65 : vector<8x32xf32>
    %c0_22 = arith.constant 0 : index
    %c0_23 = arith.constant 0 : index
    %67 = vector.load %arg14[%c0_22, %c0_23] : memref<1x32xf32, #tpu.memory_space<vmem>>, vector<1x32xf32>
    %68 = vector.shape_cast %67 : vector<1x32xf32> to vector<32xf32>
    %c0_24 = arith.constant 0 : index
    %c0_25 = arith.constant 0 : index
    %69 = vector.load %arg15[%c0_24, %c0_25] : memref<1x32xf32, #tpu.memory_space<vmem>>, vector<1x32xf32>
    %70 = vector.shape_cast %69 : vector<1x32xf32> to vector<32xf32>
    %cst_26 = arith.constant dense<0.000000e+00> : vector<8xf32>
    %71 = vector.multi_reduction <add>, %66, %cst_26 [1] : vector<8x32xf32> to vector<8xf32>
    %72 = vector.shape_cast %71 : vector<8xf32> to vector<8x1xf32>
    %cst_27 = arith.constant 3.200000e+01 : f32
    %73 = vector.broadcast %cst_27 : f32 to vector<8x1xf32>
    %74 = arith.divf %72, %73 : vector<8x1xf32>
    %75 = vector.broadcast %74 : vector<8x1xf32> to vector<8x32xf32>
    %76 = arith.subf %66, %75 : vector<8x32xf32>
    %77 = arith.mulf %76, %76 : vector<8x32xf32>
    %cst_28 = arith.constant dense<0.000000e+00> : vector<8xf32>
    %78 = vector.multi_reduction <add>, %77, %cst_28 [1] : vector<8x32xf32> to vector<8xf32>
    %79 = vector.shape_cast %78 : vector<8xf32> to vector<8x1xf32>
    %cst_29 = arith.constant 3.200000e+01 : f32
    %80 = vector.broadcast %cst_29 : f32 to vector<8x1xf32>
    %81 = arith.divf %79, %80 : vector<8x1xf32>
    %82 = vector.broadcast %74 : vector<8x1xf32> to vector<8x32xf32>
    %83 = arith.subf %66, %82 : vector<8x32xf32>
    %cst_30 = arith.constant 9.99999974E-6 : f32
    %84 = vector.broadcast %cst_30 : f32 to vector<8x1xf32>
    %85 = arith.addf %81, %84 : vector<8x1xf32>
    %86 = math.rsqrt %85 : vector<8x1xf32>
    %87 = vector.broadcast %86 : vector<8x1xf32> to vector<8x32xf32>
    %88 = arith.mulf %83, %87 : vector<8x32xf32>
    %89 = vector.shape_cast %68 : vector<32xf32> to vector<1x32xf32>
    %90 = vector.broadcast %89 : vector<1x32xf32> to vector<8x32xf32>
    %91 = arith.mulf %88, %90 : vector<8x32xf32>
    %92 = vector.shape_cast %70 : vector<32xf32> to vector<1x32xf32>
    %93 = vector.broadcast %92 : vector<1x32xf32> to vector<8x32xf32>
    %94 = arith.addf %91, %93 : vector<8x32xf32>
    %95 = arith.truncf %94 : vector<8x32xf32> to vector<8x32xbf16>
    %c0_31 = arith.constant 0 : index
    %c0_32 = arith.constant 0 : index
    %96 = vector.load %arg16[%c0_31, %c0_32] : memref<32x64xbf16, #tpu.memory_space<vmem>>, vector<32x64xbf16>
    %cst_33 = arith.constant dense<0.000000e+00> : vector<8x64xf32>
    %97 = tpu.matmul %95, %96, %cst_33 {dimension_numbers = #tpu.dot_dimension_numbers<[1], [0], [0], [1], [0, 0, 1, 1], [], []>} : vector<8x32xbf16>, vector<32x64xbf16>, vector<8x64xf32> -> vector<8x64xf32>
    %c0_34 = arith.constant 0 : index
    %c0_35 = arith.constant 0 : index
    %98 = vector.load %arg17[%c0_34, %c0_35] : memref<1x64xf32, #tpu.memory_space<vmem>>, vector<1x64xf32>
    %99 = vector.shape_cast %98 : vector<1x64xf32> to vector<64xf32>
    %100 = vector.shape_cast %99 : vector<64xf32> to vector<1x64xf32>
    %101 = vector.broadcast %100 : vector<1x64xf32> to vector<8x64xf32>
    %102 = arith.addf %97, %101 : vector<8x64xf32>
    %cst_36 = arith.constant 5.000000e-01 : f32
    %103 = vector.broadcast %cst_36 : f32 to vector<8x64xf32>
    %104 = arith.mulf %103, %102 : vector<8x64xf32>
    %cst_37 = arith.constant 0.707106769 : f32
    %105 = vector.broadcast %cst_37 : f32 to vector<8x64xf32>
    %106 = arith.mulf %102, %105 : vector<8x64xf32>
    %107 = math.erf %106 : vector<8x64xf32>
    %cst_38 = arith.constant 1.000000e+00 : f32
    %108 = vector.broadcast %cst_38 : f32 to vector<8x64xf32>
    %109 = arith.addf %108, %107 : vector<8x64xf32>
    %110 = arith.mulf %104, %109 : vector<8x64xf32>
    %111 = arith.truncf %110 : vector<8x64xf32> to vector<8x64xbf16>
    %c0_39 = arith.constant 0 : index
    %c0_40 = arith.constant 0 : index
    %112 = vector.load %arg18[%c0_39, %c0_40] : memref<64x32xbf16, #tpu.memory_space<vmem>>, vector<64x32xbf16>
    %cst_41 = arith.constant dense<0.000000e+00> : vector<8x32xf32>
    %113 = tpu.matmul %111, %112, %cst_41 {dimension_numbers = #tpu.dot_dimension_numbers<[1], [0], [0], [1], [0, 0, 1, 1], [], []>} : vector<8x64xbf16>, vector<64x32xbf16>, vector<8x32xf32> -> vector<8x32xf32>
    %c0_42 = arith.constant 0 : index
    %c0_43 = arith.constant 0 : index
    %114 = vector.load %arg19[%c0_42, %c0_43] : memref<1x32xf32, #tpu.memory_space<vmem>>, vector<1x32xf32>
    %115 = vector.shape_cast %114 : vector<1x32xf32> to vector<32xf32>
    %116 = vector.shape_cast %115 : vector<32xf32> to vector<1x32xf32>
    %117 = vector.broadcast %116 : vector<1x32xf32> to vector<8x32xf32>
    %118 = arith.addf %113, %117 : vector<8x32xf32>
    %119 = arith.addf %66, %118 : vector<8x32xf32>
    %c0_44 = arith.constant 0 : index
    %c0_45 = arith.constant 0 : index
    %c0_46 = arith.constant 0 : index
    %120 = vector.load %arg20[%c0_44, %c0_45, %c0_46] : memref<1x8x32xf32, #tpu.memory_space<vmem>>, vector<1x8x32xf32>
    %121 = vector.shape_cast %120 : vector<1x8x32xf32> to vector<8x32xf32>
    %122 = vector.shape_cast %119 : vector<8x32xf32> to vector<1x8x32xf32>
    tpu.vector_store %arg20[%c0_44, %c0_45, %c0_46], %122 {strides = array<i32>} : memref<1x8x32xf32, #tpu.memory_space<vmem>>, vector<1x8x32xf32>,
    return
  }
  func.func @transform_0(%arg0: i32, %arg1: i32) -> (i32, i32, i32) {
    %c0_i32 = arith.constant 0 : i32
    %c0_i32_0 = arith.constant 0 : i32
    %c0_i32_1 = arith.constant 0 : i32
    return %arg0, %c0_i32, %c0_i32_0 : i32, i32, i32
  }
  func.func @transform_1(%arg0: i32, %arg1: i32) -> (i32, i32, i32) {
    %c0_i32 = arith.constant 0 : i32
    %c0_i32_0 = arith.constant 0 : i32
    return %arg0, %arg1, %c0_i32 : i32, i32, i32
  }
  func.func @transform_2(%arg0: i32, %arg1: i32) -> (i32, i32) {
    %c0_i32 = arith.constant 0 : i32
    %c0_i32_0 = arith.constant 0 : i32
    %c0_i32_1 = arith.constant 0 : i32
    return %c0_i32, %c0_i32_0 : i32, i32
  }
  func.func @transform_3(%arg0: i32, %arg1: i32) -> (i32, i32) {
    %c0_i32 = arith.constant 0 : i32
    %c0_i32_0 = arith.constant 0 : i32
    %c0_i32_1 = arith.constant 0 : i32
    return %c0_i32, %c0_i32_0 : i32, i32
  }
  func.func @transform_4(%arg0: i32, %arg1: i32) -> (i32, i32, i32) {
    %c0_i32 = arith.constant 0 : i32
    %c0_i32_0 = arith.constant 0 : i32
    %c0_i32_1 = arith.constant 0 : i32
    %c0_i32_2 = arith.constant 0 : i32
    return %c0_i32, %c0_i32_0, %c0_i32_1 : i32, i32, i32
  }
  func.func @transform_5(%arg0: i32, %arg1: i32) -> (i32, i32, i32) {
    %c0_i32 = arith.constant 0 : i32
    %c0_i32_0 = arith.constant 0 : i32
    %c0_i32_1 = arith.constant 0 : i32
    %c0_i32_2 = arith.constant 0 : i32
    return %c0_i32, %c0_i32_0, %c0_i32_1 : i32, i32, i32
  }
  func.func @transform_6(%arg0: i32, %arg1: i32) -> (i32, i32, i32) {
    %c0_i32 = arith.constant 0 : i32
    %c0_i32_0 = arith.constant 0 : i32
    %c0_i32_1 = arith.constant 0 : i32
    %c0_i32_2 = arith.constant 0 : i32
    return %c0_i32, %c0_i32_0, %c0_i32_1 : i32, i32, i32
  }
  func.func @transform_7(%arg0: i32, %arg1: i32) -> (i32, i32, i32) {
    %c0_i32 = arith.constant 0 : i32
    %c0_i32_0 = arith.constant 0 : i32
    %c0_i32_1 = arith.constant 0 : i32
    %c0_i32_2 = arith.constant 0 : i32
    return %c0_i32, %c0_i32_0, %c0_i32_1 : i32, i32, i32
  }
  func.func @transform_8(%arg0: i32, %arg1: i32) -> (i32, i32, i32) {
    %c0_i32 = arith.constant 0 : i32
    %c0_i32_0 = arith.constant 0 : i32
    %c0_i32_1 = arith.constant 0 : i32
    %c0_i32_2 = arith.constant 0 : i32
    return %c0_i32, %c0_i32_0, %c0_i32_1 : i32, i32, i32
  }
  func.func @transform_9(%arg0: i32, %arg1: i32) -> (i32, i32, i32) {
    %c0_i32 = arith.constant 0 : i32
    %c0_i32_0 = arith.constant 0 : i32
    %c0_i32_1 = arith.constant 0 : i32
    %c0_i32_2 = arith.constant 0 : i32
    return %c0_i32, %c0_i32_0, %c0_i32_1 : i32, i32, i32
  }
  func.func @transform_10(%arg0: i32, %arg1: i32) -> (i32, i32, i32) {
    %c0_i32 = arith.constant 0 : i32
    %c0_i32_0 = arith.constant 0 : i32
    %c0_i32_1 = arith.constant 0 : i32
    %c0_i32_2 = arith.constant 0 : i32
    return %c0_i32, %c0_i32_0, %c0_i32_1 : i32, i32, i32
  }
  func.func @transform_11(%arg0: i32, %arg1: i32) -> (i32, i32) {
    %c0_i32 = arith.constant 0 : i32
    %c0_i32_0 = arith.constant 0 : i32
    %c0_i32_1 = arith.constant 0 : i32
    return %c0_i32, %c0_i32_0 : i32, i32
  }
  func.func @transform_12(%arg0: i32, %arg1: i32) -> (i32, i32) {
    %c0_i32 = arith.constant 0 : i32
    %c0_i32_0 = arith.constant 0 : i32
    %c0_i32_1 = arith.constant 0 : i32
    return %c0_i32, %c0_i32_0 : i32, i32
  }
  func.func @transform_13(%arg0: i32, %arg1: i32) -> (i32, i32) {
    %c0_i32 = arith.constant 0 : i32
    %c0_i32_0 = arith.constant 0 : i32
    %c0_i32_1 = arith.constant 0 : i32
    return %c0_i32, %c0_i32_0 : i32, i32
  }
  func.func @transform_14(%arg0: i32, %arg1: i32) -> (i32, i32) {
    %c0_i32 = arith.constant 0 : i32
    %c0_i32_0 = arith.constant 0 : i32
    %c0_i32_1 = arith.constant 0 : i32
    return %c0_i32, %c0_i32_0 : i32, i32
  }
  func.func @transform_15(%arg0: i32, %arg1: i32) -> (i32, i32) {
    %c0_i32 = arith.constant 0 : i32
    %c0_i32_0 = arith.constant 0 : i32
    %c0_i32_1 = arith.constant 0 : i32
    return %c0_i32, %c0_i32_0 : i32, i32
  }
  func.func @transform_16(%arg0: i32, %arg1: i32) -> (i32, i32) {
    %c0_i32 = arith.constant 0 : i32
    %c0_i32_0 = arith.constant 0 : i32
    %c0_i32_1 = arith.constant 0 : i32
    return %c0_i32, %c0_i32_0 : i32, i32
  }
  func.func @transform_17(%arg0: i32, %arg1: i32) -> (i32, i32) {
    %c0_i32 = arith.constant 0 : i32
    %c0_i32_0 = arith.constant 0 : i32
    %c0_i32_1 = arith.constant 0 : i32
    return %c0_i32, %c0_i32_0 : i32, i32
  }
  func.func @transform_18(%arg0: i32, %arg1: i32) -> (i32, i32, i32) {
    %c0_i32 = arith.constant 0 : i32
    %c0_i32_0 = arith.constant 0 : i32
    return %arg0, %arg1, %c0_i32 : i32, i32, i32
  }
}

</mosaic_0001>

<bundles_post_ra>
// kernel: tpu_custom_call.1
= control target key start
LH: loop header
LB: loop body
LE: loop exit
PB: predicated region body
PF: predicated region fallthrough
CT: control target
= control target key end

     0   :  { %s2031_s0 = inlined_call_operand.vmem [shape: f32[2,8,32], index: 0, kind: input, shape index: {}]   ;;  %s2032_s1 = inlined_call_operand.vmem [shape: f32[2,8,32], index: 1, kind: input, shape index: {}]   ;;  %s2033_s2 = inlined_call_operand.vmem [shape: f32[1,32], index: 2, kind: input, shape index: {}]   ;;  %s2034_s3 = inlined_call_operand.vmem [shape: f32[1,32], index: 3, kind: input, shape index: {}]   ;;  %s2035_s4 = inlined_call_operand.vmem [shape: bf16[4,32,8], index: 4, kind: input, shape index: {}]   ;;  %s2036_s5 = inlined_call_operand.vmem [shape: f32[4,1,8], index: 5, kind: input, shape index: {}]   ;;  %s2037_s6 = inlined_call_operand.vmem [shape: bf16[4,32,8], index: 6, kind: input, shape index: {}]   ;;  %s2038_s7 = inlined_call_operand.vmem [shape: f32[4,1,8], index: 7, kind: input, shape index: {}]   ;;  %s2039_s8 = inlined_call_operand.vmem [shape: bf16[4,32,8], index: 8, kind: input, shape index: {}]   ;;  %s2040_s9 = inlined_call_operand.vmem [shape: f32[4,1,8], index: 9, kind: input, shape index: {}]   ;;  %s2041_s10 = inlined_call_operand.vmem [shape: bf16[4,8,32], index: 10, kind: input, shape index: {}]   ;;  %s2042_s11 = inlined_call_operand.vmem [shape: f32[1,32], index: 11, kind: input, shape index: {}]   ;;  %s2043_s12 = inlined_call_operand.vmem [shape: f32[1,32], index: 12, kind: input, shape index: {}]   ;;  %s2044_s13 = inlined_call_operand.vmem [shape: f32[1,32], index: 13, kind: input, shape index: {}]   ;;  %s2045_s14 = inlined_call_operand.vmem [shape: bf16[32,64], index: 14, kind: input, shape index: {}]   ;;  %s2046_s15 = inlined_call_operand.vmem [shape: f32[1,64], index: 15, kind: input, shape index: {}]   ;;  %s2047_s16 = inlined_call_operand.vmem [shape: bf16[64,32], index: 16, kind: input, shape index: {}]   ;;  %s2048_s17 = inlined_call_operand.vmem [shape: f32[1,32], index: 17, kind: input, shape index: {}]   ;;  %s2049_s18 = inlined_call_operand.hbm [shape: f32[2,8,32], index: 18, kind: output, shape index: {}]  }
   0x1   :  { %2057 = sst [smem:[#allocation9_spill]] %s2031_s0 }
   0x2   :  { %2058 = sst [smem:[#allocation10_spill]] %s2032_s1 }
   0x3   :  { %2059 = sst [smem:[#allocation11_spill]] %s2033_s2 }
   0x4   :  { %2060 = sst [smem:[#allocation12_spill]] %s2034_s3 }
   0x5   :  { %2061 = sst [smem:[#allocation13_spill]] %s2035_s4 }
   0x6   :  { %2062 = sst [smem:[#allocation14_spill]] %s2048_s17 }
   0x7   :  { %2063 = sst [smem:[#allocation15_spill]] %s2049_s18 }
   0x8   :  { %23 = vsyncpa [#allocation3], 0 }
   0x9   :  { %25 = vsyncpa [#allocation3 + $0x1], 0  ;;  %s1777_s27 = smov 0   ;;  %s1779_s28 = smov 0  }
   0xa   :  { %s1781_s29 = smov 0   ;;  %s1783_s30 = smov 0  }
   0xb   :  { %s1785_s0 = smov 0   ;;  %s1787_s19 = smov 0  }
   0xc LB: > { %2064 = sst [smem:[#allocation5_spill]] %s1647_s27  ;;  %s1349_s1 = sadd.s32 4294967295, %s1667_s19   ;;  %s1667_s19 = sphi %s1787_s19, %s31_s19   ;;  %s1663_s0 = sphi %s1785_s0, %s2084_s0   ;;  %s1659_s30 = sphi %s1783_s30, %s2083_s30   ;;  %s1655_s29 = sphi %s1781_s29, %s2087_s29   ;;  %s1651_s28 = sphi %s1779_s28, %s2086_s28   ;;  %s1647_s27 = sphi %s1777_s27, %s2085_s27  }
   0xd   : > { %2065 = sst [smem:[#allocation6_spill]] %s1663_s0  ;;  %s1350_s20 = sadd.s32 4294967294, %s1667_s19  }
   0xe   : > { %s43_s21 = sadd.s32 1, %s1663_s0  ;;  %s442_s22 = sadd.s32 1, %s1655_s29 }
   0xf   : > { %p45_p0 = scmp.ge.s32.totalorder %s43_s21, 2  ;;  %p452_p1 = scmp.ne.s32.totalorder %s1655_s29, %s1651_s28 }
  0x10   : > { %p453_p2 = scmp.eq.s32.totalorder %s1349_s1, 1  ;;  %p458_p3 = scmp.ne.s32.totalorder %s1651_s28, %s1647_s27 }
  0x11   : > { %s2089_s21 = smov (%p45_p0, %s43_s21), 0  ;;  %p459_p5 = scmp.eq.s32.totalorder %s1350_s20, 1 }
  0x12   : > { %2066 = sst [smem:[#allocation7_spill]] %s2089_s21  ;;  %p1817_p4 = por %p453_p2, %p452_p1 }
  0x13   : > { %s437_s23 = ssub.s32 %s1663_s0, %s2089_s21  ;;  %p1353_p6 = scmp.ge.s32.totalorder %s1667_s19, 1 }
  0x14   : > { %s2067_s2 = scalar_select %p1817_p4, 1, 0 }
  0x15   : > { %p440_p7 = scmp.eq.s32.totalorder %s437_s23, 0  ;;  %p1824_p8 = por %p459_p5, %p458_p3 }
  0x16   : > { %2068 = sst [smem:[#allocation8_spill]] %s2067_s2  ;;  %p542_p9 = scmp.lt.s32.totalorder %s1667_s19, 3 }
  0x17   : > { %s1830_s25 = scalar_select %p440_p7, %s1655_s29, %s442_s22  }
  0x18   : > { %p543_p10 = pnand %p1353_p6, %p542_p9 }
  0x19   : > { %p602_p11 = scmp.lt.s32.totalorder (!%p543_p10), %s1659_s30, 1  ;;  %s2070_s21 = sld [smem:[#allocation9_spill]] (!%p543_p10) }
  0x1a   : > { %546 = sbr.rel (%p543_p10) target bundleno = 2203 (0x89b), region = 92  ;;  %s2071_s2 = sld [smem:[#allocation10_spill]] (!%p543_p10) }
  0x1b   : > { %s2073_s3 = sld [smem:[#allocation12_spill]] (!%p543_p10) }
  0x1f   : > { %s603_s26 = scalar_select %p602_p11, %s1659_s30, 1  ;;  %vm618_vm0 = vcmask 261120   ;;  %v1866_v32 = vmov 0.0  }
  0x21   : > { %s1355_s1 = sshll.u32 %s603_s26, 3  ;;  %v1358_v23 = vld [vmem:[%s2073_s3] ss:$0 sm:$0xff] }
  0x22   : > { %s605_s0 = scalar_lea.vmem %s2070_s21, %s1355_s1  ;;  %s612_s17 = scalar_lea.vmem %s2071_s2, %s1355_s1 }
  0x23   : > { %v614_v0 = vld [vmem:[%s605_s0] sm:$0xff]  ;;  %s2072_s21 = sld [smem:[#allocation11_spill]]  ;;  %s1868_s1 = smov 0  }
  0x24   : > { %v1840_v1 = vld [vmem:[%s612_s17] sm:$0xff]  ;;  %v619_v2 = vsel %vm618_vm0, %v614_v0, 0.0  ;;  %s2056_s17 = sand.u32 1, %s1651_s28  }
  0x25   : > { %620 = vadd.xlane.f32.xlu0 %v619_v2  ;;  %v648_v3 = vsel %vm618_vm0, %v1840_v1, 0.0  ;;  %s1851_s18 = sshll.u32 %s2056_s17, 3 }
  0x29   : > { %649 = vadd.xlane.f32.xlu0 %v648_v3  ;;  %v1357_v21 = vld [vmem:[%s2072_s21] ss:$0 sm:$0xff] }
  0xae   : > { %v621_v4 = vpop.xlane.xlu0 %620 }
  0xaf   : > { %v623_v5 = vmul.f32 0.03125, %v621_v4 }
  0xb1   : > { %v624_v6 = vsub.f32 %v614_v0, %v623_v5 }
  0xb2   : > { %v650_v7 = vpop.xlane.xlu0 %649 }
  0xb3   : > { %v651_v8 = vmul.f32 0.03125, %v650_v7  ;;  %v625_v9 = vmul.f32 %v624_v6, %v624_v6 }
  0xb5   : > { %v652_v10 = vsub.f32 %v1840_v1, %v651_v8  ;;  %v626_v11 = vsel %vm618_vm0, %v625_v9, 0.0 }
  0xb6   : > { %627 = vadd.xlane.f32.xlu1 %v626_v11 }
  0xb7   : > { %v653_v12 = vmul.f32 %v652_v10, %v652_v10 }
  0xb9   : > { %v654_v13 = vsel %vm618_vm0, %v653_v12, 0.0 }
  0xba   : > { %655 = vadd.xlane.f32.xlu1 %v654_v13 }
 0x13f   : > { %v628_v14 = vpop.xlane.xlu1 %627 }
 0x140   : > { %v629_v15 = vmul.f32 0.03125, %v628_v14 }
 0x142   : > { %v630_v16 = vadd.f32 1e-05, %v629_v15 }
 0x143   : > { %v656_v17 = vpop.xlane.xlu1 %655 }
 0x144   : > { %1559 = vrsqrt.f32 %v630_v16  ;;  %v657_v18 = vmul.f32 0.03125, %v656_v17 }
 0x146   : > { %v658_v19 = vadd.f32 1e-05, %v657_v18 }
 0x148   : > { %1561 = vrsqrt.f32 %v658_v19 }
 0x151   : > { %v1560_v20 = vpop.eup %1559 }
 0x152   : > { %v632_v22 = vmul.f32 %v1560_v20, %v624_v6 }
 0x154   : > { %v639_v24 = vmul.f32 %v1357_v21, %v632_v22 }
 0x155   : > { %v1562_v25 = vpop.eup %1561 }
 0x156   : > { %v646_v26 = vadd.f32 %v1358_v23, %v639_v24  ;;  %v660_v27 = vmul.f32 %v1562_v25, %v652_v10 }
 0x158   : > { %v1859_v28 = vpack.c.bf16 %v646_v26, %v646_v26  ;;  %v661_v29 = vmul.f32 %v1357_v21, %v660_v27 }
 0x15a   : > { %v1861_v30 = vadd.f32 %v1358_v23, %v661_v29 }
 0x15c   : > { %v663_v31 = vpack.c.bf16 %v1861_v30, %v1861_v30 }
 0x15d LB: >> { %v1677_v33 = vmov 0.0   ;;  %s1396_s20 = sshll.u32 %s1675_s1, 4  ;;  %vm1678_vm1 = vmmov 0   ;;  %s2074_s4 = sld [smem:[#allocation13_spill]]  ;;  %vm878_vm2 = vcmask 64512   ;;  %vm941_vm3 = vcmask 1043456   ;;  %s1675_s1 = sphi %s1868_s1, %s669_s1   ;;  %v1671_v32 = vphi %v1866_v32, %v2075_v32  }
 0x15e   : >> { %1430 = vmatprep.subr.bf16.mxu1 %v1677_v33  ;;  %1422 = vmatprep.subr.bf16.mxu0 %v1677_v33  ;;  %s742_s0 = scalar_lea.vmem %s2037_s6, %s1396_s20  ;;  %s1888_s3 = scalar_lea.vmem %s2039_s8, %s1396_s20 }
 0x15f   : >> { %1434 = vmatprep.mubr.msk.bf16.mxu1 %vm1678_vm1, %v1677_v33  ;;  %1426 = vmatprep.mubr.msk.bf16.mxu0 %vm1678_vm1, %v1677_v33  ;;  %v1563_v34 = vld [vmem:[%s742_s0 + $0x8] sm:$0xff]   ;;  %v1565_v36 = vld [vmem:[%s742_s0] sm:$0xff]   ;;  %s678_s0 = scalar_lea.vmem %s2036_s5, %s1675_s1  ;;  %s816_s22 = scalar_lea.vmem %s2040_s9, %s1675_s1 }
 0x160   : >> { %1431 = vmatpush3.bf16.msra.mxu1 %v1563_v34  ;;  %v1361_v43 = vld [vmem:[%s678_s0] ss:$0 sm:$0xff]  ;;  %v1567_v53 = vld [vmem:[%s1888_s3 + $0x8] sm:$0xff]  }
 0x161   : >> { %1432 = vmatprep.subr.bf16.mxu1 %v1677_v33  ;;  %v1568_v54 = vld [vmem:[%s1888_s3] sm:$0xff]  }
 0x162   : >> { %v1371_v3 = vld [vmem:[%s816_s22] ss:$0 sm:$0xff] }
 0x163   : >> { %s673_s2 = scalar_lea.vmem %s2074_s4, %s1396_s20  ;;  %s747_s20 = scalar_lea.vmem %s2038_s7, %s1675_s1 }
 0x164   : >> { %v1564_v35 = vld [vmem:[%s673_s2 + $0x8] sm:$0xff]   ;;  %v1566_v37 = vld [vmem:[%s673_s2] sm:$0xff]   ;;  %1433 = vmatpush3.bf16.msra.mxu1 %v1565_v36  ;;  %s1377_s2 = sshll.u32 %s1675_s1, 2  ;;  %s669_s1 = sadd.s32 1, %s1675_s1  }
 0x165   : >> { %1423 = vmatpush3.bf16.msra.mxu0 %v1564_v35  ;;  %1446 = vmatprep.subr.bf16.mxu1 %v1677_v33  ;;  %v1366_v38 = vld [vmem:[%s747_s20] ss:$0 sm:$0xff]  ;;  %s987_s20 = scalar_lea.vmem %s2041_s10, %s1377_s2  ;;  %p666_p12 = scmp.ge.s32.totalorder %s669_s1, 4  }
 0x166   : >> { %1424 = vmatprep.subr.bf16.mxu0 %v1677_v33  ;;  %v988_v10 = vld [vmem:[%s987_s20] sm:$0xf]  ;;  %v1679_v30 = vmov (%p666_p12), 0.0   ;;  %vm1680_vm4 = vmmov (%p666_p12), 0   ;;  %vm1186_vm5 = vcmask (%p666_p12), 523264   ;;  %s2076_s23 = sld [smem:[#allocation14_spill]] (%p666_p12) }
 0x167   : >> { %1435 = vmatmul.mubr.msk.bf16.vlgmr.msra.gmra.mxu1 %vm618_vm0, %v1859_v28  ;;  %v993_v11 = vsel %vm941_vm3, %v988_v10, 0  ;;  %v1379_v26 = vld [vmem:[%s2042_s11] ss:$0 sm:$0xff] (%p666_p12)  ;;  %s1393_s1 = sshll.u32 (%p666_p12), %s1659_s30, 7  ;;  %s2078_s0 = scalar_lea.vmem (%p666_p12), [#allocation2], %s1851_s18 }
 0x168   : >> { %1448 = vmatprep.mubr.msk.bf16.mxu1 %vm1678_vm1, %v1677_v33  ;;  %s1247_s3 = sshll.u32 (%p666_p12), %s2078_s0, 4  ;;  %s2079_s2 = sld [smem:[#allocation15_spill]] (%p666_p12)  ;;  %s1982_s3 = int_to_ptr.vmem [resolvable:$true] %s1247_s3 }
 0x169   : >> { %1425 = vmatpush3.bf16.msra.mxu0 %v1566_v37  ;;  %s2080_s26 = smov (%p666_p12), %s2078_s0  ;;  %s2081_s30 = sand.u32 (%p666_p12), 1, %s1651_s28  }
 0x16a   : >> { %1438 = vmatprep.subr.bf16.mxu0 %v1677_v33  ;;  %s1233_s20 = scalar_lea.sflag (%p666_p12), [#allocation3], %s2081_s30  ;;  %s1681_s0 = smov (%p666_p12), [#allocation2]  }
 0x16c   : >> { %1427 = vmatmul.mubr.msk.bf16.vlgmr.msra.gmra.mxu0 %vm618_vm0, %v663_v31 }
 0x16d   : >> { %1442 = vmatprep.mubr.msk.bf16.mxu0 %vm1678_vm1, %v1677_v33  ;;  %1439 = vmatpush3.bf16.msra.mxu0 %v1567_v53 }
 0x16e   : >> { %1440 = vmatprep.subr.bf16.mxu0 %v1677_v33  ;;  %s1980_s17 = scalar_lea.hbm (%p666_p12), %s2079_s2, %s1393_s1  ;;  %s1587_s1 = sshll.u32 (%p666_p12), %s1681_s0, 4  ;;  %s1588_s1 = int_to_ptr.vmem [resolvable:$false] %s1587_s1 }
 0x16f   : > { %s1589_s21 = scalar_lea.vmem (%p666_p12), %s1588_s1, 256  ;;  %p1590_p2 = scmp.lt.s32.totalorder (%p666_p12), %s1982_s3, %s1588_s1 }
 0x171   : >> { %1441 = vmatpush3.bf16.msra.mxu0 %v1568_v54 }
 0x172   : >> { %1452 = vmatprep.subr.bf16.mxu0 %v1677_v33 }
 0x174   : >> { %1443 = vmatmul.mubr.msk.bf16.vlgmr.msra.gmra.mxu0 %vm618_vm0, %v1859_v28  ;;  %v1573_v28 = vld [vmem:[%s2045_s14 + $0x8] sm:$0xff] (%p666_p12)  }
 0x175   : >> { %1454 = vmatprep.mubr.msk.bf16.mxu0 %vm1678_vm1, %v1677_v33 }
 0x227   : >> { %v804_v39 = vpop.f32.mrf.mxu1 }
 0x228   : >> { %v805_v40 = vadd.f32 %v1366_v38, %v804_v39 }
 0x229   : >> { %v1436_v42 = vpop.f32.mrf.mxu1 }
 0x22a   : >> { %v877_v44 = vpack.c.bf16 %v805_v40, %v805_v40 }
 0x22b   : >> { %v807_v46 = vpop.f32.mrf.mxu1 }
 0x22c   : >> { %v735_v41 = vpop.f32.mrf.mxu0  ;;  %v883_v47 = vsel %vm878_vm2, %v877_v44, 0 }
 0x22d   : >> { %v736_v48 = vadd.f32 %v1361_v43, %v735_v41  ;;  %v1437_v50 = vpop.f32.mrf.mxu1  ;;  %1447 = vmatpush3.bf16.xpose.msra.mxu1 %v883_v47  ;;  %v1380_v41 = vld [vmem:[%s2043_s12] ss:$0 sm:$0xff] (%p666_p12)  ;;  %v1575_v47 = vld [vmem:[%s2047_s16 + $0x18] sm:$0xff] (%p666_p12)  }
 0x22e   : >> { %v1428_v45 = vpop.f32.mrf.mxu0  ;;  %1458 = vmatprep.subr.bf16.mxu1 %v1677_v33  ;;  %v1381_v43 = vld [vmem:[%s2044_s13] ss:$0 sm:$0xff] (%p666_p12) }
 0x22f   : >> { %v876_v52 = vpack.c.bf16 %v736_v48, %v736_v48  ;;  %v1576_v48 = vld [vmem:[%s2047_s16 + $0x10] sm:$0xff] (%p666_p12)   ;;  %v1578_v50 = vld [vmem:[%s2047_s16] sm:$0xff] (%p666_p12)  }
 0x230   : >> { %v738_v49 = vpop.f32.mrf.mxu0 }
 0x231   : > { %v1577_v49 = vld [vmem:[%s2047_s16 + $0x8] sm:$0xff] (%p666_p12)  }
 0x232   : >> { %v1429_v51 = vpop.f32.mrf.mxu0 }
 0x233   : > { %v1382_v51 = vld [vmem:[%s2046_s15] ss:$0 sm:$0xff] (%p666_p12) }
 0x234   : >> { %1449 = vmatmul.mubr.msk.bf16.vlgmr.msra.gmra.mxu1 %vm878_vm2, %v876_v52  ;;  %v870_v2 = vpop.f32.mrf.mxu0 }
 0x235   : >> { %1460 = vmatprep.mubr.msk.bf16.mxu1 %vm1678_vm1, %v1677_v33  ;;  %v871_v4 = vadd.f32 %v1371_v3, %v870_v2  ;;  %1459 = vmatpush3.bf16.msra.mxu1 %v993_v11 }
 0x236   : >> { %v1444_v5 = vpop.f32.mrf.mxu0  ;;  %1472 = vmatprep.subr.bf16.mxu1 (%p666_p12), %v1679_v30 }
 0x237   : >> { %v937_v6 = vpack.c.bf16 %v871_v4, %v871_v4 }
 0x238   : >> { %v873_v7 = vpop.f32.mrf.mxu0 }
 0x239   : >> { %v943_v8 = vsel %vm941_vm3, %v937_v6, 0 }
 0x23a   : >> { %v1445_v9 = vpop.f32.mrf.mxu0  ;;  %1453 = vmatpush3.bf16.msra.mxu0 %v943_v8 }
 0x23b   : > { %1464 = vmatprep.subr.bf16.mxu0 (%p666_p12), %v1679_v30 }
 0x2f4   : >> { %v919_v55 = vpop.f32.mrf.mxu1 }
 0x2f5   : >> { %v925_v56 = vsel %vm878_vm2, %v919_v55, -inf }
 0x2f6   : >> { %926 = vmax.xlane.f32.xlu0 %v925_v56  ;;  %v1450_v57 = vpop.f32.mrf.mxu1 }
 0x2f8   : >> { %v922_v58 = vpop.f32.mrf.mxu1 }
 0x2fa   : >> { %v1451_v59 = vpop.f32.mrf.mxu1 }
 0x37f   : >> { %v927_v60 = vpop.xlane.xlu0 %926 }
 0x380   : >> { %v928_v61 = vsub.f32 %v919_v55, %v927_v60 }
 0x382   : >> { %v929_v62 = vmul.f32 1.442695, %v928_v61 }
 0x384   : >> { %1569 = vpow2.f32 %v929_v62 }
 0x391   : >> { %v1570_v63 = vpop.eup %1569 }
 0x392   : >> { %v931_v0 = vsel %vm878_vm2, %v1570_v63, 0.0 }
 0x393   : >> { %932 = vadd.xlane.f32.xlu0 %v931_v0 }
 0x41c   : >> { %v933_v12 = vpop.xlane.xlu0 %932 }
 0x41d   : >> { %1571 = vrcp.f32 %v933_v12 }
 0x42a   : >> { %v1572_v13 = vpop.eup %1571 }
 0x42b   : >> { %v935_v14 = vmul.f32 %v1572_v13, %v1570_v63  ;;  %v1386_v63 = vld [vmem:[%s2076_s23] ss:$0 sm:$0xff] (%p666_p12)  ;;  %s1583_s23 = scalar_lea.vmem (%p666_p12), %s1982_s3, 128 }
 0x42c   : > { %p1584_p13 = scmp.ne.s32.totalorder (%p666_p12), %s1982_s3, %s1583_s23  ;;  %p1591_p3 = scmp.lt.s32.totalorder (%p666_p12), %s1589_s21, %s1583_s23 }
 0x42d   : >> { %v936_v15 = vpack.c.bf16 %v935_v14, %v935_v14 }
 0x42e   : > { %p1585_p0 = pnand (%p666_p12), %p1584_p13, %p1817_p4  ;;  %p1592_p5 = por (%p666_p12), %p1591_p3, %p1590_p2 }
 0x42f   : >> { %1455 = vmatmul.mubr.msk.bf16.vlgmr.msra.gmra.mxu0 %vm878_vm2, %v936_v15 }
 0x430   : > { %1468 = vmatprep.mubr.msk.bf16.mxu0 (%p666_p12), %vm1680_vm4, %v1679_v30  ;;  %1465 = vmatpush3.bf16.msra.mxu0 (%p666_p12), %v1573_v28  ;;  %p1586_p1 = pneg (%p666_p12), %p1585_p0 }
 0x431   : > { %1466 = vmatprep.subr.bf16.mxu0 (%p666_p12), %v1679_v30 }
 0x432   : > { %p1593_p6 = pnand (%p666_p12), %p1592_p5, %p1586_p1 }
 0x4ef   : >> { %v979_v16 = vpop.f32.mrf.mxu0 }
 0x4f0   : >> { %v985_v17 = vpack.c.bf16 %v979_v16, %v979_v16 }
 0x4f1   : >> { %v1456_v18 = vpop.f32.mrf.mxu0 }
 0x4f2   : >> { %1461 = vmatmul.mubr.msk.bf16.vlgmr.msra.gmra.mxu1 %vm878_vm2, %v985_v17 }
 0x4f3   : >> { %v982_v19 = vpop.f32.mrf.mxu0  ;;  %1480 = vmatprep.mubr.msk.bf16.mxu1 (%p666_p12), %vm1680_vm4, %v1679_v30  ;;  %1473 = vmatpush3.bf16.msra.mxu1 (%p666_p12), %v1575_v47 }
 0x4f4   : > { %1474 = vmatprep.subr.bf16.mxu1 (%p666_p12), %v1679_v30 }
 0x4f5   : >> { %v1457_v20 = vpop.f32.mrf.mxu0 }
 0x4f7   : > { %1475 = vmatpush3.bf16.msra.mxu1 (%p666_p12), %v1576_v48 }
 0x4f8   : > { %1476 = vmatprep.subr.bf16.mxu1 (%p666_p12), %v1679_v30 }
 0x4fb   : > { %1477 = vmatpush3.bf16.msra.mxu1 (%p666_p12), %v1577_v49 }
 0x4fc   : > { %1478 = vmatprep.subr.bf16.mxu1 (%p666_p12), %v1679_v30 }
 0x4ff   : > { %1479 = vmatpush3.bf16.msra.mxu1 (%p666_p12), %v1578_v50 }
 0x5b2   : >> { %v1029_v21 = vpop.f32.mrf.mxu1 }
 0x5b3   : >> { %v1035_v22 = vadd.f32 %v1671_v32, %v1029_v21  }
 0x5b4   : >> { %v1462_v23 = vpop.f32.mrf.mxu1  ;;  %668 = sbr.rel (!%p666_p12) target bundleno = 349 (0x15d), region = 144 }
 0x5b5   : >> { %v2075_v32 = vmov %v1035_v22  ;;  %v1043_v27 = vadd.f32 (%p666_p12), %v1379_v26, %v1035_v22 }
 0x5b6   : >> { %v1032_v24 = vpop.f32.mrf.mxu1 }
 0x5b7   : > { %v1936_v29 = vadd.f32 (%p666_p12), %v1043_v27, %v1840_v1  ;;  %v1574_v1 = vld [vmem:[%s2045_s14] sm:$0xff] (%p666_p12)  }
 0x5b8   : >> { %v1463_v25 = vpop.f32.mrf.mxu1  ;;  %1467 = vmatpush3.bf16.msra.mxu0 (%p666_p12), %v1574_v1 }
 0x5b9   : > { %v1047_v32 = vsel %vm618_vm0, %v1936_v29, 0.0 }
 0x5ba   : > { %1048 = vadd.xlane.f32.xlu0 %v1047_v32 }
 0x643   : > { %v1049_v33 = vpop.xlane.xlu0 %1048 }
 0x644   : > { %v1050_v34 = vmul.f32 0.03125, %v1049_v33 }
 0x646   : > { %v1051_v35 = vsub.f32 %v1936_v29, %v1050_v34 }
 0x648   : > { %v1052_v36 = vmul.f32 %v1051_v35, %v1051_v35 }
 0x64a   : > { %v1053_v37 = vsel %vm618_vm0, %v1052_v36, 0.0 }
 0x64b   : > { %1054 = vadd.xlane.f32.xlu0 %v1053_v37 }
 0x6d4   : > { %v1055_v31 = vpop.xlane.xlu0 %1054 }
 0x6d5   : > { %v1056_v38 = vmul.f32 0.03125, %v1055_v31 }
 0x6d7   : > { %v1057_v39 = vadd.f32 1e-05, %v1056_v38 }
 0x6d9   : > { %1579 = vrsqrt.f32 %v1057_v39 }
 0x6e6   : > { %v1580_v40 = vpop.eup %1579 }
 0x6e7   : > { %v1059_v42 = vmul.f32 %v1580_v40, %v1051_v35 }
 0x6e9   : > { %v1066_v44 = vmul.f32 %v1380_v41, %v1059_v42 }
 0x6eb   : > { %v1073_v45 = vadd.f32 %v1381_v43, %v1066_v44 }
 0x6ed   : > { %v1074_v46 = vpack.c.bf16 %v1073_v45, %v1073_v45 }
 0x6ef   : > { %1469 = vmatmul.mubr.msk.bf16.vlgmr.msra.gmra.mxu0 %vm618_vm0, %v1074_v46 }
 0x7af   : > { %v1135_v52 = vpop.f32.mrf.mxu0 }
 0x7b0   : > { %v1136_v53 = vadd.f32 %v1382_v51, %v1135_v52 }
 0x7b1   : > { %v1470_v54 = vpop.f32.mrf.mxu0 }
 0x7b2   : > { %v1142_v55 = vmul.f32 0.70710677, %v1136_v53  ;;  %v1141_v59 = vmul.f32 0.5, %v1136_v53 }
 0x7b3   : > { %v1138_v56 = vpop.f32.mrf.mxu0 }
 0x7b4   : > { %1581 = verf.f32 %v1142_v55 }
 0x7b5   : > { %v1471_v57 = vpop.f32.mrf.mxu0 }
 0x7c1   : > { %v1582_v58 = vpop.eup %1581 }
 0x7c2   : > { %v1144_v60 = vadd.f32 1.0, %v1582_v58 }
 0x7c4   : > { %v1145_v61 = vmul.f32 %v1144_v60, %v1141_v59 }
 0x7c6   : > { %v1146_v62 = vpack.c.bf16 %v1145_v61, %v1145_v61 }
 0x7c8   : > { %1481 = vmatmul.mubr.msk.bf16.vlgmr.msra.gmra.mxu1 %vm1186_vm5, %v1146_v62 }
 0x888   : > { %v1224_v0 = vpop.f32.mrf.mxu1 }
 0x889   : > { %v1225_v2 = vadd.f32 %v1386_v63, %v1224_v0 }
 0x88a   : > { %v1482_v3 = vpop.f32.mrf.mxu1 }
 0x88b   : > { %v1230_v4 = vadd.f32 %v1225_v2, %v1936_v29 }
 0x88c   : > { %v1227_v5 = vpop.f32.mrf.mxu1 }
 0x88d   : > { %1231 = vst.msk [vmem:[%s2080_s26] sm:$0xff] %vm618_vm0, %v1230_v4 }
 0x88e   : > { %v1483_v6 = vpop.f32.mrf.mxu1 }
 0x88f   : > { %1596 = shalt.err (!%p1593_p6)
}
 0x890   : > { %s1597_s18 = scalar_lea.hbm %s1980_s17, 128  ;;  %s1601_s30 = scalar_lea.hbm %s2079_s2, 256 }
 0x891   : > { %p1598_p7 = scmp.ne.s32.totalorder %s1980_s17, %s1597_s18  ;;  %p1602_p11 = scmp.lt.s32.totalorder %s1980_s17, %s2079_s2 }
 0x892   : > { %p1603_p12 = scmp.lt.s32.totalorder %s1601_s30, %s1597_s18 }
 0x893   : > { %p1599_p9 = pnand %p1598_p7, %p1817_p4 }
 0x894   : > { %p1604_p13 = por %p1603_p12, %p1602_p11 }
 0x895   : > { %p1600_p10 = pneg %p1599_p9 }
 0x897   : > { %p1605_p0 = pnand %p1604_p13, %p1600_p10 }
 0x899   : > { %1608 = shalt.err (!%p1605_p0)
}
 0x89a   : > { %1484 = dma.vmem_to_hbm [thread:$0]  (%p1817_p4), %s1982_s3, 128, %s1980_s17, %s1233_s20  }
 0x89b PF: > { %s2082_s23 = sld [smem:[#allocation5_spill]]  ;;  %p1490_p1 = scmp.ge.s32.totalorder %s1667_s19, 2 }
 0x89d   : > { %p1487_p2 = pnand %p1490_p1, %p1824_p8 }
 0x89f   : > { %p1488_p3 = pneg %p1487_p2 }
 0x8a1   : > { %s1259_s1 = sand.u32 1, %s2082_s23  }
 0x8a2   : > { %s1260_s4 = scalar_lea.sflag [#allocation3], %s1259_s1 }
 0x8a3   : > { %1642 = dma.done.wait (%p1488_p3), %s1260_s4, 128  }
 0x8a4   : > { %1644 = vsyncadd (%p1488_p3), %s1260_s4, 4294967168  ;;  %s31_s19 = sadd.s32 1, %s1667_s19   ;;  %s2083_s30 = sld [smem:[#allocation6_spill]] }
 0x8a5   : > { %p28_p5 = scmp.ge.s32.totalorder %s31_s19, 4   ;;  %s2084_s0 = sld [smem:[#allocation7_spill]] }
 0x8a6   : > { %s2085_s27 = smov %s1651_s28  ;;  %s2086_s28 = smov %s1655_s29 }
 0x8a7   : > { %s2087_s29 = smov %s1830_s25  ;;  %30 = sbr.rel (!%p28_p5) target bundleno = 12 (0xc), region = 155 }
 0x8ac   :  { %1265 = vsyncpa [#allocation3], 1 }
 0x8ad   :  { %1267 = vsyncpa [#allocation3 + $0x1], 1 }

// kernel: tpu_custom_call.1
= control target key start
LH: loop header
LB: loop body
LE: loop exit
PB: predicated region body
PF: predicated region fallthrough
CT: control target
= control target key end

     0   :  { %s2031_s0 = inlined_call_operand.vmem [shape: f32[2,8,32], index: 0, kind: input, shape index: {}]   ;;  %s2032_s1 = inlined_call_operand.vmem [shape: f32[2,8,32], index: 1, kind: input, shape index: {}]   ;;  %s2033_s2 = inlined_call_operand.vmem [shape: f32[1,32], index: 2, kind: input, shape index: {}]   ;;  %s2034_s3 = inlined_call_operand.vmem [shape: f32[1,32], index: 3, kind: input, shape index: {}]   ;;  %s2035_s4 = inlined_call_operand.vmem [shape: bf16[4,32,8], index: 4, kind: input, shape index: {}]   ;;  %s2036_s5 = inlined_call_operand.vmem [shape: f32[4,1,8], index: 5, kind: input, shape index: {}]   ;;  %s2037_s6 = inlined_call_operand.vmem [shape: bf16[4,32,8], index: 6, kind: input, shape index: {}]   ;;  %s2038_s7 = inlined_call_operand.vmem [shape: f32[4,1,8], index: 7, kind: input, shape index: {}]   ;;  %s2039_s8 = inlined_call_operand.vmem [shape: bf16[4,32,8], index: 8, kind: input, shape index: {}]   ;;  %s2040_s9 = inlined_call_operand.vmem [shape: f32[4,1,8], index: 9, kind: input, shape index: {}]   ;;  %s2041_s10 = inlined_call_operand.vmem [shape: bf16[4,8,32], index: 10, kind: input, shape index: {}]   ;;  %s2042_s11 = inlined_call_operand.vmem [shape: f32[1,32], index: 11, kind: input, shape index: {}]   ;;  %s2043_s12 = inlined_call_operand.vmem [shape: f32[1,32], index: 12, kind: input, shape index: {}]   ;;  %s2044_s13 = inlined_call_operand.vmem [shape: f32[1,32], index: 13, kind: input, shape index: {}]   ;;  %s2045_s14 = inlined_call_operand.vmem [shape: bf16[32,64], index: 14, kind: input, shape index: {}]   ;;  %s2046_s15 = inlined_call_operand.vmem [shape: f32[1,64], index: 15, kind: input, shape index: {}]   ;;  %s2047_s16 = inlined_call_operand.vmem [shape: bf16[64,32], index: 16, kind: input, shape index: {}]   ;;  %s2048_s17 = inlined_call_operand.vmem [shape: f32[1,32], index: 17, kind: input, shape index: {}]   ;;  %s2049_s18 = inlined_call_operand.hbm [shape: f32[2,8,32], index: 18, kind: output, shape index: {}]  }
   0x1   :  { %2057 = sst [smem:[#allocation9_spill]] %s2031_s0 }
   0x2   :  { %2058 = sst [smem:[#allocation10_spill]] %s2032_s1 }
   0x3   :  { %2059 = sst [smem:[#allocation11_spill]] %s2033_s2 }
   0x4   :  { %2060 = sst [smem:[#allocation12_spill]] %s2034_s3 }
   0x5   :  { %2061 = sst [smem:[#allocation13_spill]] %s2035_s4 }
   0x6   :  { %2062 = sst [smem:[#allocation14_spill]] %s2048_s17 }
   0x7   :  { %2063 = sst [smem:[#allocation15_spill]] %s2049_s18 }
   0x8   :  { %23 = vsyncpa [#allocation3], 0 }
   0x9   :  { %25 = vsyncpa [#allocation3 + $0x1], 0  ;;  %s1777_s27 = smov 0   ;;  %s1779_s28 = smov 0  }
   0xa   :  { %s1781_s29 = smov 0   ;;  %s1783_s30 = smov 0  }
   0xb   :  { %s1785_s0 = smov 0   ;;  %s1787_s19 = smov 0  }
   0xc LB: > { %2064 = sst [smem:[#allocation5_spill]] %s1647_s27  ;;  %s1349_s1 = sadd.s32 4294967295, %s1667_s19   ;;  %s1667_s19 = sphi %s1787_s19, %s31_s19   ;;  %s1663_s0 = sphi %s1785_s0, %s2084_s0   ;;  %s1659_s30 = sphi %s1783_s30, %s2083_s30   ;;  %s1655_s29 = sphi %s1781_s29, %s2087_s29   ;;  %s1651_s28 = sphi %s1779_s28, %s2086_s28   ;;  %s1647_s27 = sphi %s1777_s27, %s2085_s27  }
   0xd   : > { %2065 = sst [smem:[#allocation6_spill]] %s1663_s0  ;;  %s1350_s20 = sadd.s32 4294967294, %s1667_s19  }
   0xe   : > { %s43_s21 = sadd.s32 1, %s1663_s0  ;;  %s442_s22 = sadd.s32 1, %s1655_s29 }
   0xf   : > { %p45_p0 = scmp.ge.s32.totalorder %s43_s21, 2  ;;  %p452_p1 = scmp.ne.s32.totalorder %s1655_s29, %s1651_s28 }
  0x10   : > { %p453_p2 = scmp.eq.s32.totalorder %s1349_s1, 1  ;;  %p458_p3 = scmp.ne.s32.totalorder %s1651_s28, %s1647_s27 }
  0x11   : > { %s2089_s21 = smov (%p45_p0, %s43_s21), 0  ;;  %p459_p5 = scmp.eq.s32.totalorder %s1350_s20, 1 }
  0x12   : > { %2066 = sst [smem:[#allocation7_spill]] %s2089_s21  ;;  %p1817_p4 = por %p453_p2, %p452_p1 }
  0x13   : > { %s437_s23 = ssub.s32 %s1663_s0, %s2089_s21  ;;  %p1353_p6 = scmp.ge.s32.totalorder %s1667_s19, 1 }
  0x14   : > { %s2067_s2 = scalar_select %p1817_p4, 1, 0 }
  0x15   : > { %p440_p7 = scmp.eq.s32.totalorder %s437_s23, 0  ;;  %p1824_p8 = por %p459_p5, %p458_p3 }
  0x16   : > { %2068 = sst [smem:[#allocation8_spill]] %s2067_s2  ;;  %p542_p9 = scmp.lt.s32.totalorder %s1667_s19, 3 }
  0x17   : > { %s1830_s25 = scalar_select %p440_p7, %s1655_s29, %s442_s22  }
  0x18   : > { %p543_p10 = pnand %p1353_p6, %p542_p9 }
  0x19   : > { %p602_p11 = scmp.lt.s32.totalorder (!%p543_p10), %s1659_s30, 1  ;;  %s2070_s21 = sld [smem:[#allocation9_spill]] (!%p543_p10) }
  0x1a   : > { %546 = sbr.rel (%p543_p10) target bundleno = 2203 (0x89b), region = 92  ;;  %s2071_s2 = sld [smem:[#allocation10_spill]] (!%p543_p10) }
  0x1b   : > { %s2073_s3 = sld [smem:[#allocation12_spill]] (!%p543_p10) }
  0x1f   : > { %s603_s26 = scalar_select %p602_p11, %s1659_s30, 1  ;;  %vm618_vm0 = vcmask 261120   ;;  %v1866_v32 = vmov 0.0  }
  0x21   : > { %s1355_s1 = sshll.u32 %s603_s26, 3  ;;  %v1358_v23 = vld [vmem:[%s2073_s3] ss:$0 sm:$0xff] }
  0x22   : > { %s605_s0 = scalar_lea.vmem %s2070_s21, %s1355_s1  ;;  %s612_s17 = scalar_lea.vmem %s2071_s2, %s1355_s1 }
  0x23   : > { %v614_v0 = vld [vmem:[%s605_s0] sm:$0xff]  ;;  %s2072_s21 = sld [smem:[#allocation11_spill]]  ;;  %s1868_s1 = smov 0  }
  0x24   : > { %v1840_v1 = vld [vmem:[%s612_s17] sm:$0xff]  ;;  %v619_v2 = vsel %vm618_vm0, %v614_v0, 0.0  ;;  %s2056_s17 = sand.u32 1, %s1651_s28  }
  0x25   : > { %620 = vadd.xlane.f32.xlu0 %v619_v2  ;;  %v648_v3 = vsel %vm618_vm0, %v1840_v1, 0.0  ;;  %s1851_s18 = sshll.u32 %s2056_s17, 3 }
  0x29   : > { %649 = vadd.xlane.f32.xlu0 %v648_v3  ;;  %v1357_v21 = vld [vmem:[%s2072_s21] ss:$0 sm:$0xff] }
  0xae   : > { %v621_v4 = vpop.xlane.xlu0 %620 }
  0xaf   : > { %v623_v5 = vmul.f32 0.03125, %v621_v4 }
  0xb1   : > { %v624_v6 = vsub.f32 %v614_v0, %v623_v5 }
  0xb2   : > { %v650_v7 = vpop.xlane.xlu0 %649 }
  0xb3   : > { %v651_v8 = vmul.f32 0.03125, %v650_v7  ;;  %v625_v9 = vmul.f32 %v624_v6, %v624_v6 }
  0xb5   : > { %v652_v10 = vsub.f32 %v1840_v1, %v651_v8  ;;  %v626_v11 = vsel %vm618_vm0, %v625_v9, 0.0 }
  0xb6   : > { %627 = vadd.xlane.f32.xlu1 %v626_v11 }
  0xb7   : > { %v653_v12 = vmul.f32 %v652_v10, %v652_v10 }
  0xb9   : > { %v654_v13 = vsel %vm618_vm0, %v653_v12, 0.0 }
  0xba   : > { %655 = vadd.xlane.f32.xlu1 %v654_v13 }
 0x13f   : > { %v628_v14 = vpop.xlane.xlu1 %627 }
 0x140   : > { %v629_v15 = vmul.f32 0.03125, %v628_v14 }
 0x142   : > { %v630_v16 = vadd.f32 1e-05, %v629_v15 }
 0x143   : > { %v656_v17 = vpop.xlane.xlu1 %655 }
 0x144   : > { %1559 = vrsqrt.f32 %v630_v16  ;;  %v657_v18 = vmul.f32 0.03125, %v656_v17 }
 0x146   : > { %v658_v19 = vadd.f32 1e-05, %v657_v18 }
 0x148   : > { %1561 = vrsqrt.f32 %v658_v19 }
 0x151   : > { %v1560_v20 = vpop.eup %1559 }
 0x152   : > { %v632_v22 = vmul.f32 %v1560_v20, %v624_v6 }
 0x154   : > { %v639_v24 = vmul.f32 %v1357_v21, %v632_v22 }
 0x155   : > { %v1562_v25 = vpop.eup %1561 }
 0x156   : > { %v646_v26 = vadd.f32 %v1358_v23, %v639_v24  ;;  %v660_v27 = vmul.f32 %v1562_v25, %v652_v10 }
 0x158   : > { %v1859_v28 = vpack.c.bf16 %v646_v26, %v646_v26  ;;  %v661_v29 = vmul.f32 %v1357_v21, %v660_v27 }
 0x15a   : > { %v1861_v30 = vadd.f32 %v1358_v23, %v661_v29 }
 0x15c   : > { %v663_v31 = vpack.c.bf16 %v1861_v30, %v1861_v30 }
 0x15d LB: >> { %v1677_v33 = vmov 0.0   ;;  %s1396_s20 = sshll.u32 %s1675_s1, 4  ;;  %vm1678_vm1 = vmmov 0   ;;  %s2074_s4 = sld [smem:[#allocation13_spill]]  ;;  %vm878_vm2 = vcmask 64512   ;;  %vm941_vm3 = vcmask 1043456   ;;  %s1675_s1 = sphi %s1868_s1, %s669_s1   ;;  %v1671_v32 = vphi %v1866_v32, %v2075_v32  }
 0x15e   : >> { %1430 = vmatprep.subr.bf16.mxu1 %v1677_v33  ;;  %1422 = vmatprep.subr.bf16.mxu0 %v1677_v33  ;;  %s742_s0 = scalar_lea.vmem %s2037_s6, %s1396_s20  ;;  %s1888_s3 = scalar_lea.vmem %s2039_s8, %s1396_s20 }
 0x15f   : >> { %1434 = vmatprep.mubr.msk.bf16.mxu1 %vm1678_vm1, %v1677_v33  ;;  %1426 = vmatprep.mubr.msk.bf16.mxu0 %vm1678_vm1, %v1677_v33  ;;  %v1563_v34 = vld [vmem:[%s742_s0 + $0x8] sm:$0xff]   ;;  %v1565_v36 = vld [vmem:[%s742_s0] sm:$0xff]   ;;  %s678_s0 = scalar_lea.vmem %s2036_s5, %s1675_s1  ;;  %s816_s22 = scalar_lea.vmem %s2040_s9, %s1675_s1 }
 0x160   : >> { %1431 = vmatpush3.bf16.msra.mxu1 %v1563_v34  ;;  %v1361_v43 = vld [vmem:[%s678_s0] ss:$0 sm:$0xff]  ;;  %v1567_v53 = vld [vmem:[%s1888_s3 + $0x8] sm:$0xff]  }
 0x161   : >> { %1432 = vmatprep.subr.bf16.mxu1 %v1677_v33  ;;  %v1568_v54 = vld [vmem:[%s1888_s3] sm:$0xff]  }
 0x162   : >> { %v1371_v3 = vld [vmem:[%s816_s22] ss:$0 sm:$0xff] }
 0x163   : >> { %s673_s2 = scalar_lea.vmem %s2074_s4, %s1396_s20  ;;  %s747_s20 = scalar_lea.vmem %s2038_s7, %s1675_s1 }
 0x164   : >> { %v1564_v35 = vld [vmem:[%s673_s2 + $0x8] sm:$0xff]   ;;  %v1566_v37 = vld [vmem:[%s673_s2] sm:$0xff]   ;;  %1433 = vmatpush3.bf16.msra.mxu1 %v1565_v36  ;;  %s1377_s2 = sshll.u32 %s1675_s1, 2  ;;  %s669_s1 = sadd.s32 1, %s1675_s1  }
 0x165   : >> { %1423 = vmatpush3.bf16.msra.mxu0 %v1564_v35  ;;  %1446 = vmatprep.subr.bf16.mxu1 %v1677_v33  ;;  %v1366_v38 = vld [vmem:[%s747_s20] ss:$0 sm:$0xff]  ;;  %s987_s20 = scalar_lea.vmem %s2041_s10, %s1377_s2  ;;  %p666_p12 = scmp.ge.s32.totalorder %s669_s1, 4  }
 0x166   : >> { %1424 = vmatprep.subr.bf16.mxu0 %v1677_v33  ;;  %v988_v10 = vld [vmem:[%s987_s20] sm:$0xf]  ;;  %v1679_v30 = vmov (%p666_p12), 0.0   ;;  %vm1680_vm4 = vmmov (%p666_p12), 0   ;;  %vm1186_vm5 = vcmask (%p666_p12), 523264   ;;  %s2076_s23 = sld [smem:[#allocation14_spill]] (%p666_p12) }
 0x167   : >> { %1435 = vmatmul.mubr.msk.bf16.vlgmr.msra.gmra.mxu1 %vm618_vm0, %v1859_v28  ;;  %v993_v11 = vsel %vm941_vm3, %v988_v10, 0  ;;  %v1379_v26 = vld [vmem:[%s2042_s11] ss:$0 sm:$0xff] (%p666_p12)  ;;  %s1393_s1 = sshll.u32 (%p666_p12), %s1659_s30, 7  ;;  %s2078_s0 = scalar_lea.vmem (%p666_p12), [#allocation2], %s1851_s18 }
 0x168   : >> { %1448 = vmatprep.mubr.msk.bf16.mxu1 %vm1678_vm1, %v1677_v33  ;;  %s1247_s3 = sshll.u32 (%p666_p12), %s2078_s0, 4  ;;  %s2079_s2 = sld [smem:[#allocation15_spill]] (%p666_p12)  ;;  %s1982_s3 = int_to_ptr.vmem [resolvable:$true] %s1247_s3 }
 0x169   : >> { %1425 = vmatpush3.bf16.msra.mxu0 %v1566_v37  ;;  %s2080_s26 = smov (%p666_p12), %s2078_s0  ;;  %s2081_s30 = sand.u32 (%p666_p12), 1, %s1651_s28  }
 0x16a   : >> { %1438 = vmatprep.subr.bf16.mxu0 %v1677_v33  ;;  %s1233_s20 = scalar_lea.sflag (%p666_p12), [#allocation3], %s2081_s30  ;;  %s1681_s0 = smov (%p666_p12), [#allocation2]  }
 0x16c   : >> { %1427 = vmatmul.mubr.msk.bf16.vlgmr.msra.gmra.mxu0 %vm618_vm0, %v663_v31 }
 0x16d   : >> { %1442 = vmatprep.mubr.msk.bf16.mxu0 %vm1678_vm1, %v1677_v33  ;;  %1439 = vmatpush3.bf16.msra.mxu0 %v1567_v53 }
 0x16e   : >> { %1440 = vmatprep.subr.bf16.mxu0 %v1677_v33  ;;  %s1980_s17 = scalar_lea.hbm (%p666_p12), %s2079_s2, %s1393_s1  ;;  %s1587_s1 = sshll.u32 (%p666_p12), %s1681_s0, 4  ;;  %s1588_s1 = int_to_ptr.vmem [resolvable:$false] %s1587_s1 }
 0x16f   : > { %s1589_s21 = scalar_lea.vmem (%p666_p12), %s1588_s1, 256  ;;  %p1590_p2 = scmp.lt.s32.totalorder (%p666_p12), %s1982_s3, %s1588_s1 }
 0x171   : >> { %1441 = vmatpush3.bf16.msra.mxu0 %v1568_v54 }
 0x172   : >> { %1452 = vmatprep.subr.bf16.mxu0 %v1677_v33 }
 0x174   : >> { %1443 = vmatmul.mubr.msk.bf16.vlgmr.msra.gmra.mxu0 %vm618_vm0, %v1859_v28  ;;  %v1573_v28 = vld [vmem:[%s2045_s14 + $0x8] sm:$0xff] (%p666_p12)  }
 0x175   : >> { %1454 = vmatprep.mubr.msk.bf16.mxu0 %vm1678_vm1, %v1677_v33 }
 0x227   : >> { %v804_v39 = vpop.f32.mrf.mxu1 }
 0x228   : >> { %v805_v40 = vadd.f32 %v1366_v38, %v804_v39 }
 0x229   : >> { %v1436_v42 = vpop.f32.mrf.mxu1 }
 0x22a   : >> { %v877_v44 = vpack.c.bf16 %v805_v40, %v805_v40 }
 0x22b   : >> { %v807_v46 = vpop.f32.mrf.mxu1 }
 0x22c   : >> { %v735_v41 = vpop.f32.mrf.mxu0  ;;  %v883_v47 = vsel %vm878_vm2, %v877_v44, 0 }
 0x22d   : >> { %v736_v48 = vadd.f32 %v1361_v43, %v735_v41  ;;  %v1437_v50 = vpop.f32.mrf.mxu1  ;;  %1447 = vmatpush3.bf16.xpose.msra.mxu1 %v883_v47  ;;  %v1380_v41 = vld [vmem:[%s2043_s12] ss:$0 sm:$0xff] (%p666_p12)  ;;  %v1575_v47 = vld [vmem:[%s2047_s16 + $0x18] sm:$0xff] (%p666_p12)  }
 0x22e   : >> { %v1428_v45 = vpop.f32.mrf.mxu0  ;;  %1458 = vmatprep.subr.bf16.mxu1 %v1677_v33  ;;  %v1381_v43 = vld [vmem:[%s2044_s13] ss:$0 sm:$0xff] (%p666_p12) }
 0x22f   : >> { %v876_v52 = vpack.c.bf16 %v736_v48, %v736_v48  ;;  %v1576_v48 = vld [vmem:[%s2047_s16 + $0x10] sm:$0xff] (%p666_p12)   ;;  %v1578_v50 = vld [vmem:[%s2047_s16] sm:$0xff] (%p666_p12)  }
 0x230   : >> { %v738_v49 = vpop.f32.mrf.mxu0 }
 0x231   : > { %v1577_v49 = vld [vmem:[%s2047_s16 + $0x8] sm:$0xff] (%p666_p12)  }
 0x232   : >> { %v1429_v51 = vpop.f32.mrf.mxu0 }
 0x233   : > { %v1382_v51 = vld [vmem:[%s2046_s15] ss:$0 sm:$0xff] (%p666_p12) }
 0x234   : >> { %1449 = vmatmul.mubr.msk.bf16.vlgmr.msra.gmra.mxu1 %vm878_vm2, %v876_v52  ;;  %v870_v2 = vpop.f32.mrf.mxu0 }
 0x235   : >> { %1460 = vmatprep.mubr.msk.bf16.mxu1 %vm1678_vm1, %v1677_v33  ;;  %v871_v4 = vadd.f32 %v1371_v3, %v870_v2  ;;  %1459 = vmatpush3.bf16.msra.mxu1 %v993_v11 }
 0x236   : >> { %v1444_v5 = vpop.f32.mrf.mxu0  ;;  %1472 = vmatprep.subr.bf16.mxu1 (%p666_p12), %v1679_v30 }
 0x237   : >> { %v937_v6 = vpack.c.bf16 %v871_v4, %v871_v4 }
 0x238   : >> { %v873_v7 = vpop.f32.mrf.mxu0 }
 0x239   : >> { %v943_v8 = vsel %vm941_vm3, %v937_v6, 0 }
 0x23a   : >> { %v1445_v9 = vpop.f32.mrf.mxu0  ;;  %1453 = vmatpush3.bf16.msra.mxu0 %v943_v8 }
 0x23b   : > { %1464 = vmatprep.subr.bf16.mxu0 (%p666_p12), %v1679_v30 }
 0x2f4   : >> { %v919_v55 = vpop.f32.mrf.mxu1 }
 0x2f5   : >> { %v925_v56 = vsel %vm878_vm2, %v919_v55, -inf }
 0x2f6   : >> { %926 = vmax.xlane.f32.xlu0 %v925_v56  ;;  %v1450_v57 = vpop.f32.mrf.mxu1 }
 0x2f8   : >> { %v922_v58 = vpop.f32.mrf.mxu1 }
 0x2fa   : >> { %v1451_v59 = vpop.f32.mrf.mxu1 }
 0x37f   : >> { %v927_v60 = vpop.xlane.xlu0 %926 }
 0x380   : >> { %v928_v61 = vsub.f32 %v919_v55, %v927_v60 }
 0x382   : >> { %v929_v62 = vmul.f32 1.442695, %v928_v61 }
 0x384   : >> { %1569 = vpow2.f32 %v929_v62 }
 0x391   : >> { %v1570_v63 = vpop.eup %1569 }
 0x392   : >> { %v931_v0 = vsel %vm878_vm2, %v1570_v63, 0.0 }
 0x393   : >> { %932 = vadd.xlane.f32.xlu0 %v931_v0 }
 0x41c   : >> { %v933_v12 = vpop.xlane.xlu0 %932 }
 0x41d   : >> { %1571 = vrcp.f32 %v933_v12 }
 0x42a   : >> { %v1572_v13 = vpop.eup %1571 }
 0x42b   : >> { %v935_v14 = vmul.f32 %v1572_v13, %v1570_v63  ;;  %v1386_v63 = vld [vmem:[%s2076_s23] ss:$0 sm:$0xff] (%p666_p12)  ;;  %s1583_s23 = scalar_lea.vmem (%p666_p12), %s1982_s3, 128 }
 0x42c   : > { %p1584_p13 = scmp.ne.s32.totalorder (%p666_p12), %s1982_s3, %s1583_s23  ;;  %p1591_p3 = scmp.lt.s32.totalorder (%p666_p12), %s1589_s21, %s1583_s23 }
 0x42d   : >> { %v936_v15 = vpack.c.bf16 %v935_v14, %v935_v14 }
 0x42e   : > { %p1585_p0 = pnand (%p666_p12), %p1584_p13, %p1817_p4  ;;  %p1592_p5 = por (%p666_p12), %p1591_p3, %p1590_p2 }
 0x42f   : >> { %1455 = vmatmul.mubr.msk.bf16.vlgmr.msra.gmra.mxu0 %vm878_vm2, %v936_v15 }
 0x430   : > { %1468 = vmatprep.mubr.msk.bf16.mxu0 (%p666_p12), %vm1680_vm4, %v1679_v30  ;;  %1465 = vmatpush3.bf16.msra.mxu0 (%p666_p12), %v1573_v28  ;;  %p1586_p1 = pneg (%p666_p12), %p1585_p0 }
 0x431   : > { %1466 = vmatprep.subr.bf16.mxu0 (%p666_p12), %v1679_v30 }
 0x432   : > { %p1593_p6 = pnand (%p666_p12), %p1592_p5, %p1586_p1 }
 0x4ef   : >> { %v979_v16 = vpop.f32.mrf.mxu0 }
 0x4f0   : >> { %v985_v17 = vpack.c.bf16 %v979_v16, %v979_v16 }
 0x4f1   : >> { %v1456_v18 = vpop.f32.mrf.mxu0 }
 0x4f2   : >> { %1461 = vmatmul.mubr.msk.bf16.vlgmr.msra.gmra.mxu1 %vm878_vm2, %v985_v17 }
 0x4f3   : >> { %v982_v19 = vpop.f32.mrf.mxu0  ;;  %1480 = vmatprep.mubr.msk.bf16.mxu1 (%p666_p12), %vm1680_vm4, %v1679_v30  ;;  %1473 = vmatpush3.bf16.msra.mxu1 (%p666_p12), %v1575_v47 }
 0x4f4   : > { %1474 = vmatprep.subr.bf16.mxu1 (%p666_p12), %v1679_v30 }
 0x4f5   : >> { %v1457_v20 = vpop.f32.mrf.mxu0 }
 0x4f7   : > { %1475 = vmatpush3.bf16.msra.mxu1 (%p666_p12), %v1576_v48 }
 0x4f8   : > { %1476 = vmatprep.subr.bf16.mxu1 (%p666_p12), %v1679_v30 }
 0x4fb   : > { %1477 = vmatpush3.bf16.msra.mxu1 (%p666_p12), %v1577_v49 }
 0x4fc   : > { %1478 = vmatprep.subr.bf16.mxu1 (%p666_p12), %v1679_v30 }
 0x4ff   : > { %1479 = vmatpush3.bf16.msra.mxu1 (%p666_p12), %v1578_v50 }
 0x5b2   : >> { %v1029_v21 = vpop.f32.mrf.mxu1 }
 0x5b3   : >> { %v1035_v22 = vadd.f32 %v1671_v32, %v1029_v21  }
 0x5b4   : >> { %v1462_v23 = vpop.f32.mrf.mxu1  ;;  %668 = sbr.rel (!%p666_p12) target bundleno = 349 (0x15d), region = 144 }
 0x5b5   : >> { %v2075_v32 = vmov %v1035_v22  ;;  %v1043_v27 = vadd.f32 (%p666_p12), %v1379_v26, %v1035_v22 }
 0x5b6   : >> { %v1032_v24 = vpop.f32.mrf.mxu1 }
 0x5b7   : > { %v1936_v29 = vadd.f32 (%p666_p12), %v1043_v27, %v1840_v1  ;;  %v1574_v1 = vld [vmem:[%s2045_s14] sm:$0xff] (%p666_p12)  }
 0x5b8   : >> { %v1463_v25 = vpop.f32.mrf.mxu1  ;;  %1467 = vmatpush3.bf16.msra.mxu0 (%p666_p12), %v1574_v1 }
 0x5b9   : > { %v1047_v32 = vsel %vm618_vm0, %v1936_v29, 0.0 }
 0x5ba   : > { %1048 = vadd.xlane.f32.xlu0 %v1047_v32 }
 0x643   : > { %v1049_v33 = vpop.xlane.xlu0 %1048 }
 0x644   : > { %v1050_v34 = vmul.f32 0.03125, %v1049_v33 }
 0x646   : > { %v1051_v35 = vsub.f32 %v1936_v29, %v1050_v34 }
 0x648   : > { %v1052_v36 = vmul.f32 %v1051_v35, %v1051_v35 }
 0x64a   : > { %v1053_v37 = vsel %vm618_vm0, %v1052_v36, 0.0 }
 0x64b   : > { %1054 = vadd.xlane.f32.xlu0 %v1053_v37 }
 0x6d4   : > { %v1055_v31 = vpop.xlane.xlu0 %1054 }
 0x6d5   : > { %v1056_v38 = vmul.f32 0.03125, %v1055_v31 }
 0x6d7   : > { %v1057_v39 = vadd.f32 1e-05, %v1056_v38 }
 0x6d9   : > { %1579 = vrsqrt.f32 %v1057_v39 }
 0x6e6   : > { %v1580_v40 = vpop.eup %1579 }
 0x6e7   : > { %v1059_v42 = vmul.f32 %v1580_v40, %v1051_v35 }
 0x6e9   : > { %v1066_v44 = vmul.f32 %v1380_v41, %v1059_v42 }
 0x6eb   : > { %v1073_v45 = vadd.f32 %v1381_v43, %v1066_v44 }
 0x6ed   : > { %v1074_v46 = vpack.c.bf16 %v1073_v45, %v1073_v45 }
 0x6ef   : > { %1469 = vmatmul.mubr.msk.bf16.vlgmr.msra.gmra.mxu0 %vm618_vm0, %v1074_v46 }
 0x7af   : > { %v1135_v52 = vpop.f32.mrf.mxu0 }
 0x7b0   : > { %v1136_v53 = vadd.f32 %v1382_v51, %v1135_v52 }
 0x7b1   : > { %v1470_v54 = vpop.f32.mrf.mxu0 }
 0x7b2   : > { %v1142_v55 = vmul.f32 0.70710677, %v1136_v53  ;;  %v1141_v59 = vmul.f32 0.5, %v1136_v53 }
 0x7b3   : > { %v1138_v56 = vpop.f32.mrf.mxu0 }
 0x7b4   : > { %1581 = verf.f32 %v1142_v55 }
 0x7b5   : > { %v1471_v57 = vpop.f32.mrf.mxu0 }
 0x7c1   : > { %v1582_v58 = vpop.eup %1581 }
 0x7c2   : > { %v1144_v60 = vadd.f32 1.0, %v1582_v58 }
 0x7c4   : > { %v1145_v61 = vmul.f32 %v1144_v60, %v1141_v59 }
 0x7c6   : > { %v1146_v62 = vpack.c.bf16 %v1145_v61, %v1145_v61 }
 0x7c8   : > { %1481 = vmatmul.mubr.msk.bf16.vlgmr.msra.gmra.mxu1 %vm1186_vm5, %v1146_v62 }
 0x888   : > { %v1224_v0 = vpop.f32.mrf.mxu1 }
 0x889   : > { %v1225_v2 = vadd.f32 %v1386_v63, %v1224_v0 }
 0x88a   : > { %v1482_v3 = vpop.f32.mrf.mxu1 }
 0x88b   : > { %v1230_v4 = vadd.f32 %v1225_v2, %v1936_v29 }
 0x88c   : > { %v1227_v5 = vpop.f32.mrf.mxu1 }
 0x88d   : > { %1231 = vst.msk [vmem:[%s2080_s26] sm:$0xff] %vm618_vm0, %v1230_v4 }
 0x88e   : > { %v1483_v6 = vpop.f32.mrf.mxu1 }
 0x88f   : > { %1596 = shalt.err (!%p1593_p6)
}
 0x890   : > { %s1597_s18 = scalar_lea.hbm %s1980_s17, 128  ;;  %s1601_s30 = scalar_lea.hbm %s2079_s2, 256 }
 0x891   : > { %p1598_p7 = scmp.ne.s32.totalorder %s1980_s17, %s1597_s18  ;;  %p1602_p11 = scmp.lt.s32.totalorder %s1980_s17, %s2079_s2 }
 0x892   : > { %p1603_p12 = scmp.lt.s32.totalorder %s1601_s30, %s1597_s18 }
 0x893   : > { %p1599_p9 = pnand %p1598_p7, %p1817_p4 }
 0x894   : > { %p1604_p13 = por %p1603_p12, %p1602_p11 }
 0x895   : > { %p1600_p10 = pneg %p1599_p9 }
 0x897   : > { %p1605_p0 = pnand %p1604_p13, %p1600_p10 }
 0x899   : > { %1608 = shalt.err (!%p1605_p0)
}
 0x89a   : > { %1484 = dma.vmem_to_hbm [thread:$0]  (%p1817_p4), %s1982_s3, 128, %s1980_s17, %s1233_s20  }
 0x89b PF: > { %s2082_s23 = sld [smem:[#allocation5_spill]]  ;;  %p1490_p1 = scmp.ge.s32.totalorder %s1667_s19, 2 }
 0x89d   : > { %p1487_p2 = pnand %p1490_p1, %p1824_p8 }
 0x89f   : > { %p1488_p3 = pneg %p1487_p2 }
 0x8a1   : > { %s1259_s1 = sand.u32 1, %s2082_s23  }
 0x8a2   : > { %s1260_s4 = scalar_lea.sflag [#allocation3], %s1259_s1 }
 0x8a3   : > { %1642 = dma.done.wait (%p1488_p3), %s1260_s4, 128  }
 0x8a4   : > { %1644 = vsyncadd (%p1488_p3), %s1260_s4, 4294967168  ;;  %s31_s19 = sadd.s32 1, %s1667_s19   ;;  %s2083_s30 = sld [smem:[#allocation6_spill]] }
 0x8a5   : > { %p28_p5 = scmp.ge.s32.totalorder %s31_s19, 4   ;;  %s2084_s0 = sld [smem:[#allocation7_spill]] }
 0x8a6   : > { %s2085_s27 = smov %s1651_s28  ;;  %s2086_s28 = smov %s1655_s29 }
 0x8a7   : > { %s2087_s29 = smov %s1830_s25  ;;  %30 = sbr.rel (!%p28_p5) target bundleno = 12 (0xc), region = 155 }
 0x8ac   :  { %1265 = vsyncpa [#allocation3], 1 }
 0x8ad   :  { %1267 = vsyncpa [#allocation3 + $0x1], 1 }

</bundles_post_ra>
